<compile_context>
chip_gen: v5e
topology: v5e:2x2
jax: 0.10.0
libtpu: 0.0.40
codegen_flags: <defaults>
</compile_context>

<pallas_src>
import math
from functools import partial

import jax
import jax.numpy as jnp
from jax.experimental import pallas as pl
from jax.experimental.pallas import tpu as pltpu


_VMEM_LIMIT = 32 * 1024 * 1024   # scoped-VMEM budget; safe on v5e/v6e/v7x
_NORM_EPS = 1e-12                # matches torch F.normalize default eps


def _round_up(x, m):
    return ((x + m - 1) // m) * m


def _pick_block_c(c_pad):
    # Widest lane-dense class tile that fits comfortably: single tile whenever
    # possible (fewest grid steps, unmasked stores); for very large class
    # counts fall back to the widest 128-multiple divisor <= 2048 so the
    # double-buffered (512 x block_c) bf16 weight tile stays ~<= 4 MiB.
    if c_pad <= 2048:
        return c_pad
    for b in (2048, 1024, 512, 256, 128):
        if c_pad % b == 0:
            return b
    return 128


# ----------------------------------------------------------------------------
# Fused kernel: fc1+ReLU -> fc2+ReLU -> fc3 -> L2-normalize -> ArcFace head.
# Grid is 1-D over class tiles; every other operand uses a constant index_map
# so its single VMEM block is DMA'd once and stays resident.
# ----------------------------------------------------------------------------
def _fused_fc_arc_kernel(x_ref, w1_ref, b1_ref, w2_ref, b2_ref,
                         w3_ref, b3_ref, wt_ref, icn_ref, lab_ref,
                         o_ref, *, s, cos_m, sin_m, th, mm,
                         easy_margin, use_labels, block_c):
    # --- FC chain: bf16 MXU inputs, f32 accumulation, fused bias + ReLU -----
    h = jnp.dot(x_ref[...], w1_ref[...], preferred_element_type=jnp.float32)
    h = jnp.maximum(h + b1_ref[...], 0.0)
    h = jnp.dot(h.astype(jnp.bfloat16), w2_ref[...],
                preferred_element_type=jnp.float32)
    h = jnp.maximum(h + b2_ref[...], 0.0)
    f = jnp.dot(h.astype(jnp.bfloat16), w3_ref[...],
                preferred_element_type=jnp.float32) + b3_ref[...]

    # --- F.normalize(x): x * 1/max(||x||, eps); rsqrt -> EUP slot -----------
    ss = jnp.sum(f * f, axis=-1, keepdims=True)
    inv = jax.lax.rsqrt(jnp.maximum(ss, _NORM_EPS * _NORM_EPS))
    x_n = (f * inv).astype(jnp.bfloat16)                       # (B_pad, 512)

    # --- cosine = F.linear(normalize(x), normalize(W)) via exact post-matmul
    #     column scaling; 1/||W_j|| is precomputed in f32 ---------------------
    cosine = jnp.dot(x_n, wt_ref[...],
                     preferred_element_type=jnp.float32) * icn_ref[...]

    if not use_labels:                       # inference path: cosine * s
        o_ref[...] = (cosine * s).astype(o_ref.dtype)
        return

    # clip keeps sqrt NaN-free when |cosine| numerically exceeds 1 (bf16 MXU)
    sine = jnp.sqrt(jnp.clip(1.0 - cosine * cosine, 0.0, 1.0))
    phi = cosine * cos_m - sine * sin_m
    if easy_margin:
        phi = jnp.where(cosine > 0.0, phi, cosine)
    else:
        phi = jnp.where(cosine > th, phi, cosine - mm)

    col0 = pl.program_id(0) * block_c
    cls_ids = jax.lax.broadcasted_iota(jnp.int32, cosine.shape, 1) + col0
    one_hot = (cls_ids == lab_ref[...]).astype(jnp.float32)   # scatter_(1,lab,1)

    out = one_hot * phi + (1.0 - one_hot) * cosine
    o_ref[...] = (out * s).astype(o_ref.dtype)


def fused_fc_arc_head(prep, feats_flat, labels=None, *, num_classes,
                      margin_m=0.5, margin_s=64, easy_margin=False):
    """Single pallas_call for the whole post-backbone network."""
    cos_m = math.cos(margin_m)
    sin_m = math.sin(margin_m)
    th = math.cos(math.pi - margin_m)
    mm = math.sin(math.pi - margin_m) * margin_m

    B, K = feats_flat.shape
    assert prep['fc1_w'].shape[0] == K
    H1 = prep['fc1_w'].shape[1]
    H2 = prep['fc2_w'].shape[1]
    KE, C_pad = prep['arc_wt'].shape
    B_pad = _round_up(B, 16)                 # bf16 packs 2 rows per sublane
    block_c = _pick_block_c(C_pad)
    use_labels = labels is not None

    x_p = jnp.pad(feats_flat.astype(jnp.bfloat16), ((0, B_pad - B), (0, 0)))
    if use_labels:
        lab = jnp.pad(labels.reshape(-1, 1).astype(jnp.int32),
                      ((0, B_pad - B), (0, 0)), constant_values=-1)
    else:
        lab = jnp.full((B_pad, 1), -1, jnp.int32)   # unused placeholder

    kernel = partial(_fused_fc_arc_kernel, s=float(margin_s), cos_m=cos_m,
                     sin_m=sin_m, th=th, mm=mm, easy_margin=easy_margin,
                     use_labels=use_labels, block_c=block_c)

    out = pl.pallas_call(
        kernel,
        out_shape=jax.ShapeDtypeStruct((B_pad, C_pad), jnp.float32),
        grid=(C_pad // block_c,),
        in_specs=[
            pl.BlockSpec((B_pad, K), lambda c: (0, 0)),       # flattened feats
            pl.BlockSpec((K, H1), lambda c: (0, 0)),          # fc1 W (bf16)
            pl.BlockSpec((1, H1), lambda c: (0, 0)),          # fc1 b (f32)
            pl.BlockSpec((H1, H2), lambda c: (0, 0)),         # fc2 W
            pl.BlockSpec((1, H2), lambda c: (0, 0)),          # fc2 b
            pl.BlockSpec((H2, KE), lambda c: (0, 0)),         # fc3 W
            pl.BlockSpec((1, KE), lambda c: (0, 0)),          # fc3 b
            pl.BlockSpec((KE, block_c), lambda c: (0, c)),    # arc W^T tile
            pl.BlockSpec((1, block_c), lambda c: (0, c)),     # 1/||W_j|| tile
            pl.BlockSpec((B_pad, 1), lambda c: (0, 0)),       # labels
        ],
        out_specs=pl.BlockSpec((B_pad, block_c), lambda c: (0, c)),
        compiler_params=pltpu.CompilerParams(
            dimension_semantics=("parallel",),
            vmem_limit_bytes=_VMEM_LIMIT),
    )(x_p, prep['fc1_w'], prep['fc1_b'], prep['fc2_w'], prep['fc2_b'],
      prep['fc3_w'], prep['fc3_b'], prep['arc_wt'], prep['arc_icn'], lab)
    return out[:B, :num_classes]


# ----------------------------------------------------------------------------
# Scaled-down VGG-style backbone stand-in (XLA native convs — no im2col blowup).
# ----------------------------------------------------------------------------
def conv3x3_relu(x_nhwc, w, b):
    y = jax.lax.conv_general_dilated(
        x_nhwc, w, window_strides=(1, 1), padding="SAME",
        dimension_numbers=("NHWC", "HWIO", "NHWC"))
    return jnp.maximum(y + b, 0.0)


def maxpool2x2(x):
    B, H, W, C = x.shape
    if H % 2 or W % 2:
        raise ValueError("maxpool2x2 requires even spatial dims")
    return x.reshape(B, H // 2, 2, W // 2, 2, C).max(axis=(2, 4))


def backbone_features(params, input_images):
    # TODO(synk): the pretrained torchvision VGG16 backbone cannot be loaded
    # in-script; this scaled-down conv stack stands in for base_net.features.
    x = jnp.transpose(input_images, (0, 2, 3, 1)).astype(jnp.float32)  # NCHW->NHWC
    x = conv3x3_relu(x, params['c1_w'], params['c1_b'])
    x = conv3x3_relu(x, params['c2_w'], params['c2_b'])
    x = maxpool2x2(x)                                   # 32 -> 16
    x = conv3x3_relu(x, params['c3_w'], params['c3_b'])
    x = maxpool2x2(x)                                   # 16 -> 8
    x = conv3x3_relu(x, params['c4_w'], params['c4_b'])
    x = maxpool2x2(x)                                   # 8 -> 4  => (B,4,4,32)
    return x.reshape(x.shape[0], -1)                    # (B, 512)


def arc_margin_classifier_forward(prep, input_images, labels=None, *,
                                  num_classes, margin_m=0.5, margin_s=64,
                                  easy_margin=False):
    feats_flat = backbone_features(prep, input_images)
    return fused_fc_arc_head(prep, feats_flat, labels,
                             num_classes=num_classes, margin_m=margin_m,
                             margin_s=margin_s, easy_margin=easy_margin)


# ----------------------------------------------------------------------------
# One-time parameter preparation (hoisted out of the jitted forward).
# ----------------------------------------------------------------------------
def prepare_params(params):
    prep = {k: params[k] for k in ('c1_w', 'c1_b', 'c2_w', 'c2_b',
                                   'c3_w', 'c3_b', 'c4_w', 'c4_b')}
    for name in ('fc1', 'fc2', 'fc3'):
        prep[f'{name}_w'] = params[f'{name}_w'].astype(jnp.bfloat16)
        prep[f'{name}_b'] = params[f'{name}_b'].astype(jnp.float32).reshape(1, -1)

    w = params['arc_weight'].astype(jnp.float32)               # (C, 512)
    C, _ = w.shape
    C_pad = _round_up(C, 128)
    # Exact post-matmul column scaling: cosine = (x_n . W_j) * 1/||W_j||.
    inv_cn = 1.0 / jnp.maximum(jnp.linalg.norm(w, axis=1), _NORM_EPS)   # (C,)
    # pre-transposed, zero-padded class weight: padded columns have zero
    # weight and zero scale -> exact 0 cosine, sliced off in the wrapper.
    prep['arc_wt'] = jnp.pad(w.T.astype(jnp.bfloat16), ((0, 0), (0, C_pad - C)))
    prep['arc_icn'] = jnp.pad(inv_cn, (0, C_pad - C)).reshape(1, C_pad)
    return prep


# ----------------------------------------------------------------------------
# Deterministic parameter init.
# ----------------------------------------------------------------------------
def init_params(key, num_classes, k=512):
    ks = jax.random.split(key, 8)

    def conv_init(kk, cin, cout):
        bound = math.sqrt(6.0 / (9 * cin + 9 * cout))
        w = jax.random.uniform(kk, (3, 3, cin, cout), jnp.float32, -bound, bound)
        return w, jnp.zeros((cout,), jnp.float32)

    def fc_init(kk, din, dout):
        bound = math.sqrt(6.0 / (din + dout))
        w = jax.random.uniform(kk, (din, dout), jnp.float32, -bound, bound)
        return w, jnp.zeros((dout,), jnp.float32)

    p = {}
    p['c1_w'], p['c1_b'] = conv_init(ks[0], 3, 8)
    p['c2_w'], p['c2_b'] = conv_init(ks[1], 8, 8)
    p['c3_w'], p['c3_b'] = conv_init(ks[2], 8, 16)
    p['c4_w'], p['c4_b'] = conv_init(ks[3], 16, 32)
    p['fc1_w'], p['fc1_b'] = fc_init(ks[4], 512, 256)
    p['fc2_w'], p['fc2_b'] = fc_init(ks[5], 256, 256)
    p['fc3_w'], p['fc3_b'] = fc_init(ks[6], 256, k)
    # nn.init.xavier_uniform_(self.weight), shape (num_classes, k)
    bound = math.sqrt(6.0 / (num_classes + k))
    p['arc_weight'] = jax.random.uniform(ks[7], (num_classes, k), jnp.float32,
                                         -bound, bound)
    return p


# ----------------------------------------------------------------------------
# Pure-JAX f32 reference of the full forward (for correctness checking).
# ----------------------------------------------------------------------------
def reference_forward(params, input_images, labels=None, *, margin_m=0.5,
                      margin_s=64, easy_margin=False):
    x = backbone_features(params, input_images)
    h = jnp.maximum(x @ params['fc1_w'] + params['fc1_b'], 0.0)
    h = jnp.maximum(h @ params['fc2_w'] + params['fc2_b'], 0.0)
    f = h @ params['fc3_w'] + params['fc3_b']
    xn = f / jnp.maximum(jnp.linalg.norm(f, axis=1, keepdims=True), _NORM_EPS)
    w = params['arc_weight']
    wn = w / jnp.maximum(jnp.linalg.norm(w, axis=1, keepdims=True), _NORM_EPS)
    cosine = xn @ wn.T
    if labels is None:
        return cosine * margin_s
    cos_m = math.cos(margin_m)
    sin_m = math.sin(margin_m)
    th = math.cos(math.pi - margin_m)
    mm = math.sin(math.pi - margin_m) * margin_m
    sine = jnp.sqrt(jnp.clip(1.0 - cosine * cosine, 0.0, 1.0))
    phi = cosine * cos_m - sine * sin_m
    if easy_margin:
        phi = jnp.where(cosine > 0.0, phi, cosine)
    else:
        phi = jnp.where(cosine > th, phi, cosine - mm)
    one_hot = jax.nn.one_hot(labels, cosine.shape[1], dtype=cosine.dtype)
    return (one_hot * phi + (1.0 - one_hot) * cosine) * margin_s


if __name__ == "__main__":
    num_classes = 300          # C_pad = 384 -> single lane-dense class tile
    margin_s = 64

    key = jax.random.PRNGKey(0)
    k_img, k_lab, k_par = jax.random.split(key, 3)

    images = jax.random.normal(k_img, (2, 3, 32, 32), jnp.float32)   # NCHW
    labels = jax.random.randint(k_lab, (2,), 0, num_classes)
    params = init_params(k_par, num_classes, k=512)
    prep = prepare_params(params)        # one-time pad/cast/transpose

    fwd_train = jax.jit(lambda p, x, y: arc_margin_classifier_forward(
        p, x, y, num_classes=num_classes, margin_s=margin_s))
    fwd_infer = jax.jit(lambda p, x: arc_margin_classifier_forward(
        p, x, None, num_classes=num_classes, margin_s=margin_s))

    out_train = jax.block_until_ready(fwd_train(prep, images, labels))
    out_infer = jax.block_until_ready(fwd_infer(prep, images))

    assert out_train.shape == (2, num_classes)
    assert out_infer.shape == (2, num_classes)
    assert bool(jnp.all(jnp.isfinite(out_train)))
    assert bool(jnp.all(jnp.isfinite(out_infer)))

    # Compare against the pure-f32 reference in cosine units (output / s).
    # The fused kernel runs its matmuls with bf16 MXU inputs / f32 accumulation
    # so a loose-but-discriminating tolerance is used (structural bugs would
    # produce cosine errors of O(0.5)+).
    ref_train = reference_forward(params, images, labels, margin_s=margin_s)
    ref_infer = reference_forward(params, images, None, margin_s=margin_s)
    err_train = float(jnp.max(jnp.abs(out_train - ref_train))) / margin_s
    err_infer = float(jnp.max(jnp.abs(out_infer - ref_infer))) / margin_s
    assert err_infer < 0.06, f"inference mismatch vs reference: {err_infer}"
    assert err_train < 0.06, f"train mismatch vs reference: {err_train}"

    print("KERNEL_OK")
</pallas_src>

<mosaic_0001>
module attributes {stable_mosaic.version = 11 : i64} {
  func.func @_fused_fc_arc_kernel(%arg0: i32, %arg1: memref<16x512xbf16, #tpu.memory_space<vmem>>, %arg2: memref<512x256xbf16, #tpu.memory_space<vmem>>, %arg3: memref<1x256xf32, #tpu.memory_space<vmem>>, %arg4: memref<256x256xbf16, #tpu.memory_space<vmem>>, %arg5: memref<1x256xf32, #tpu.memory_space<vmem>>, %arg6: memref<256x512xbf16, #tpu.memory_space<vmem>>, %arg7: memref<1x512xf32, #tpu.memory_space<vmem>>, %arg8: memref<512x384xbf16, #tpu.memory_space<vmem>>, %arg9: memref<1x384xf32, #tpu.memory_space<vmem>>, %arg10: memref<16x1xi32, #tpu.memory_space<vmem>>, %arg11: memref<16x384xf32, #tpu.memory_space<vmem>>) attributes {dimension_semantics = [#tpu.dimension_semantics<parallel>], iteration_bounds = array<i64: 1>, scalar_prefetch = 0 : i64, scratch_operands = 0 : i64, tpu.core_type = #tpu.core_type<tc>, window_params = [{pipeline_mode = #tpu.pipeline_mode<synchronous>, transform_indices = @transform_0, window_bounds = array<i64: 16, 512>}, {pipeline_mode = #tpu.pipeline_mode<synchronous>, transform_indices = @transform_1, window_bounds = array<i64: 512, 256>}, {pipeline_mode = #tpu.pipeline_mode<synchronous>, transform_indices = @transform_2, window_bounds = array<i64: 1, 256>}, {pipeline_mode = #tpu.pipeline_mode<synchronous>, transform_indices = @transform_3, window_bounds = array<i64: 256, 256>}, {pipeline_mode = #tpu.pipeline_mode<synchronous>, transform_indices = @transform_4, window_bounds = array<i64: 1, 256>}, {pipeline_mode = #tpu.pipeline_mode<synchronous>, transform_indices = @transform_5, window_bounds = array<i64: 256, 512>}, {pipeline_mode = #tpu.pipeline_mode<synchronous>, transform_indices = @transform_6, window_bounds = array<i64: 1, 512>}, {transform_indices = @transform_7, window_bounds = array<i64: 512, 384>}, {transform_indices = @transform_8, window_bounds = array<i64: 1, 384>}, {pipeline_mode = #tpu.pipeline_mode<synchronous>, transform_indices = @transform_9, window_bounds = array<i64: 16, 1>}, {transform_indices = @transform_10, window_bounds = array<i64: 16, 384>}]} {
    %c0 = arith.constant 0 : index
    %c0_0 = arith.constant 0 : index
    %0 = vector.load %arg1[%c0, %c0_0] : memref<16x512xbf16, #tpu.memory_space<vmem>>, vector<16x512xbf16>
    %c0_1 = arith.constant 0 : index
    %c0_2 = arith.constant 0 : index
    %1 = vector.load %arg2[%c0_1, %c0_2] : memref<512x256xbf16, #tpu.memory_space<vmem>>, vector<512x256xbf16>
    %cst = arith.constant dense<0.000000e+00> : vector<16x256xf32>
    %2 = tpu.matmul %0, %1, %cst {dimension_numbers = #tpu.dot_dimension_numbers<[1], [0], [0], [1], [0, 0, 1, 1], [], []>} : vector<16x512xbf16>, vector<512x256xbf16>, vector<16x256xf32> -> vector<16x256xf32>
    %c0_3 = arith.constant 0 : index
    %c0_4 = arith.constant 0 : index
    %3 = vector.load %arg3[%c0_3, %c0_4] : memref<1x256xf32, #tpu.memory_space<vmem>>, vector<1x256xf32>
    %4 = vector.broadcast %3 : vector<1x256xf32> to vector<16x256xf32>
    %5 = arith.addf %2, %4 : vector<16x256xf32>
    %cst_5 = arith.constant 0.000000e+00 : f32
    %6 = vector.broadcast %cst_5 : f32 to vector<16x256xf32>
    %7 = arith.maximumf %5, %6 : vector<16x256xf32>
    %8 = arith.truncf %7 : vector<16x256xf32> to vector<16x256xbf16>
    %c0_6 = arith.constant 0 : index
    %c0_7 = arith.constant 0 : index
    %9 = vector.load %arg4[%c0_6, %c0_7] : memref<256x256xbf16, #tpu.memory_space<vmem>>, vector<256x256xbf16>
    %cst_8 = arith.constant dense<0.000000e+00> : vector<16x256xf32>
    %10 = tpu.matmul %8, %9, %cst_8 {dimension_numbers = #tpu.dot_dimension_numbers<[1], [0], [0], [1], [0, 0, 1, 1], [], []>} : vector<16x256xbf16>, vector<256x256xbf16>, vector<16x256xf32> -> vector<16x256xf32>
    %c0_9 = arith.constant 0 : index
    %c0_10 = arith.constant 0 : index
    %11 = vector.load %arg5[%c0_9, %c0_10] : memref<1x256xf32, #tpu.memory_space<vmem>>, vector<1x256xf32>
    %12 = vector.broadcast %11 : vector<1x256xf32> to vector<16x256xf32>
    %13 = arith.addf %10, %12 : vector<16x256xf32>
    %cst_11 = arith.constant 0.000000e+00 : f32
    %14 = vector.broadcast %cst_11 : f32 to vector<16x256xf32>
    %15 = arith.maximumf %13, %14 : vector<16x256xf32>
    %16 = arith.truncf %15 : vector<16x256xf32> to vector<16x256xbf16>
    %c0_12 = arith.constant 0 : index
    %c0_13 = arith.constant 0 : index
    %17 = vector.load %arg6[%c0_12, %c0_13] : memref<256x512xbf16, #tpu.memory_space<vmem>>, vector<256x512xbf16>
    %cst_14 = arith.constant dense<0.000000e+00> : vector<16x512xf32>
    %18 = tpu.matmul %16, %17, %cst_14 {dimension_numbers = #tpu.dot_dimension_numbers<[1], [0], [0], [1], [0, 0, 1, 1], [], []>} : vector<16x256xbf16>, vector<256x512xbf16>, vector<16x512xf32> -> vector<16x512xf32>
    %c0_15 = arith.constant 0 : index
    %c0_16 = arith.constant 0 : index
    %19 = vector.load %arg7[%c0_15, %c0_16] : memref<1x512xf32, #tpu.memory_space<vmem>>, vector<1x512xf32>
    %20 = vector.broadcast %19 : vector<1x512xf32> to vector<16x512xf32>
    %21 = arith.addf %18, %20 : vector<16x512xf32>
    %22 = arith.mulf %21, %21 : vector<16x512xf32>
    %cst_17 = arith.constant dense<0.000000e+00> : vector<16xf32>
    %23 = vector.multi_reduction <add>, %22, %cst_17 [1] : vector<16x512xf32> to vector<16xf32>
    %24 = vector.shape_cast %23 : vector<16xf32> to vector<16x1xf32>
    %cst_18 = arith.constant 1.000000e-24 : f32
    %25 = vector.broadcast %cst_18 : f32 to vector<16x1xf32>
    %26 = arith.maximumf %24, %25 : vector<16x1xf32>
    %27 = math.rsqrt %26 : vector<16x1xf32>
    %28 = vector.broadcast %27 : vector<16x1xf32> to vector<16x512xf32>
    %29 = arith.mulf %21, %28 : vector<16x512xf32>
    %30 = arith.truncf %29 : vector<16x512xf32> to vector<16x512xbf16>
    %c0_19 = arith.constant 0 : index
    %c0_20 = arith.constant 0 : index
    %31 = vector.load %arg8[%c0_19, %c0_20] : memref<512x384xbf16, #tpu.memory_space<vmem>>, vector<512x384xbf16>
    %cst_21 = arith.constant dense<0.000000e+00> : vector<16x384xf32>
    %32 = tpu.matmul %30, %31, %cst_21 {dimension_numbers = #tpu.dot_dimension_numbers<[1], [0], [0], [1], [0, 0, 1, 1], [], []>} : vector<16x512xbf16>, vector<512x384xbf16>, vector<16x384xf32> -> vector<16x384xf32>
    %c0_22 = arith.constant 0 : index
    %c0_23 = arith.constant 0 : index
    %33 = vector.load %arg9[%c0_22, %c0_23] : memref<1x384xf32, #tpu.memory_space<vmem>>, vector<1x384xf32>
    %34 = vector.broadcast %33 : vector<1x384xf32> to vector<16x384xf32>
    %35 = arith.mulf %32, %34 : vector<16x384xf32>
    %36 = arith.mulf %35, %35 : vector<16x384xf32>
    %cst_24 = arith.constant 1.000000e+00 : f32
    %37 = vector.broadcast %cst_24 : f32 to vector<16x384xf32>
    %38 = arith.subf %37, %36 : vector<16x384xf32>
    %cst_25 = arith.constant 0.000000e+00 : f32
    %cst_26 = arith.constant 1.000000e+00 : f32
    %39 = vector.broadcast %cst_25 : f32 to vector<16x384xf32>
    %40 = arith.maximumf %39, %38 : vector<16x384xf32>
    %41 = vector.broadcast %cst_26 : f32 to vector<16x384xf32>
    %42 = arith.minimumf %41, %40 : vector<16x384xf32>
    %43 = math.sqrt %42 : vector<16x384xf32>
    %cst_27 = arith.constant 0.87758255 : f32
    %44 = vector.broadcast %cst_27 : f32 to vector<16x384xf32>
    %45 = arith.mulf %35, %44 : vector<16x384xf32>
    %cst_28 = arith.constant 0.47942555 : f32
    %46 = vector.broadcast %cst_28 : f32 to vector<16x384xf32>
    %47 = arith.mulf %43, %46 : vector<16x384xf32>
    %48 = arith.subf %45, %47 : vector<16x384xf32>
    %cst_29 = arith.constant -0.87758255 : f32
    %49 = vector.broadcast %cst_29 : f32 to vector<16x384xf32>
    %50 = arith.cmpf ogt, %35, %49 : vector<16x384xf32>
    %cst_30 = arith.constant 0.239712775 : f32
    %51 = vector.broadcast %cst_30 : f32 to vector<16x384xf32>
    %52 = arith.subf %35, %51 : vector<16x384xf32>
    %53 = arith.select %50, %48, %52 : vector<16x384xi1>, vector<16x384xf32>
    %c384_i32 = arith.constant 384 : i32
    %54 = arith.muli %arg0, %c384_i32 : i32
    %55 = tpu.iota {dimensions = array<i32: 1>} : vector<16x384xi32>
    %56 = vector.broadcast %54 : i32 to vector<16x384xi32>
    %57 = arith.addi %55, %56 : vector<16x384xi32>
    %c0_31 = arith.constant 0 : index
    %c0_32 = arith.constant 0 : index
    %58 = vector.load %arg10[%c0_31, %c0_32] : memref<16x1xi32, #tpu.memory_space<vmem>>, vector<16x1xi32>
    %59 = vector.broadcast %58 : vector<16x1xi32> to vector<16x384xi32>
    %60 = arith.cmpi eq, %57, %59 : vector<16x384xi32>
    %61 = arith.extui %60 : vector<16x384xi1> to vector<16x384xi32>
    %62 = arith.sitofp %61 : vector<16x384xi32> to vector<16x384xf32>
    %63 = arith.mulf %62, %53 : vector<16x384xf32>
    %cst_33 = arith.constant 1.000000e+00 : f32
    %64 = vector.broadcast %cst_33 : f32 to vector<16x384xf32>
    %65 = arith.subf %64, %62 : vector<16x384xf32>
    %66 = arith.mulf %65, %35 : vector<16x384xf32>
    %67 = arith.addf %63, %66 : vector<16x384xf32>
    %cst_34 = arith.constant 6.400000e+01 : f32
    %68 = vector.broadcast %cst_34 : f32 to vector<16x384xf32>
    %69 = arith.mulf %67, %68 : vector<16x384xf32>
    %c0_35 = arith.constant 0 : index
    %c0_36 = arith.constant 0 : index
    %70 = vector.load %arg11[%c0_35, %c0_36] : memref<16x384xf32, #tpu.memory_space<vmem>>, vector<16x384xf32>
    tpu.vector_store %arg11[%c0_35, %c0_36], %69 {strides = array<i32>} : memref<16x384xf32, #tpu.memory_space<vmem>>, vector<16x384xf32>,
    return
  }
  func.func @transform_0(%arg0: i32) -> (i32, i32) {
    %c0_i32 = arith.constant 0 : i32
    %c0_i32_0 = arith.constant 0 : i32
    %c0_i32_1 = arith.constant 0 : i32
    return %c0_i32, %c0_i32_0 : i32, i32
  }
  func.func @transform_1(%arg0: i32) -> (i32, i32) {
    %c0_i32 = arith.constant 0 : i32
    %c0_i32_0 = arith.constant 0 : i32
    %c0_i32_1 = arith.constant 0 : i32
    return %c0_i32, %c0_i32_0 : i32, i32
  }
  func.func @transform_2(%arg0: i32) -> (i32, i32) {
    %c0_i32 = arith.constant 0 : i32
    %c0_i32_0 = arith.constant 0 : i32
    %c0_i32_1 = arith.constant 0 : i32
    return %c0_i32, %c0_i32_0 : i32, i32
  }
  func.func @transform_3(%arg0: i32) -> (i32, i32) {
    %c0_i32 = arith.constant 0 : i32
    %c0_i32_0 = arith.constant 0 : i32
    %c0_i32_1 = arith.constant 0 : i32
    return %c0_i32, %c0_i32_0 : i32, i32
  }
  func.func @transform_4(%arg0: i32) -> (i32, i32) {
    %c0_i32 = arith.constant 0 : i32
    %c0_i32_0 = arith.constant 0 : i32
    %c0_i32_1 = arith.constant 0 : i32
    return %c0_i32, %c0_i32_0 : i32, i32
  }
  func.func @transform_5(%arg0: i32) -> (i32, i32) {
    %c0_i32 = arith.constant 0 : i32
    %c0_i32_0 = arith.constant 0 : i32
    %c0_i32_1 = arith.constant 0 : i32
    return %c0_i32, %c0_i32_0 : i32, i32
  }
  func.func @transform_6(%arg0: i32) -> (i32, i32) {
    %c0_i32 = arith.constant 0 : i32
    %c0_i32_0 = arith.constant 0 : i32
    %c0_i32_1 = arith.constant 0 : i32
    return %c0_i32, %c0_i32_0 : i32, i32
  }
  func.func @transform_7(%arg0: i32) -> (i32, i32) {
    %c0_i32 = arith.constant 0 : i32
    %c0_i32_0 = arith.constant 0 : i32
    return %c0_i32, %arg0 : i32, i32
  }
  func.func @transform_8(%arg0: i32) -> (i32, i32) {
    %c0_i32 = arith.constant 0 : i32
    %c0_i32_0 = arith.constant 0 : i32
    return %c0_i32, %arg0 : i32, i32
  }
  func.func @transform_9(%arg0: i32) -> (i32, i32) {
    %c0_i32 = arith.constant 0 : i32
    %c0_i32_0 = arith.constant 0 : i32
    %c0_i32_1 = arith.constant 0 : i32
    return %c0_i32, %c0_i32_0 : i32, i32
  }
  func.func @transform_10(%arg0: i32) -> (i32, i32) {
    %c0_i32 = arith.constant 0 : i32
    %c0_i32_0 = arith.constant 0 : i32
    return %c0_i32, %arg0 : i32, i32
  }
}

</mosaic_0001>

<bundles_post_ra>
// kernel: _lambda_.1
= control target key start
LH: loop header
LB: loop body
LE: loop exit
PB: predicated region body
PF: predicated region fallthrough
CT: control target
= control target key end

     0   :  { %s5635_s1 = inlined_call_operand.vmem [shape: bf16[512,256], index: 1, kind: input, shape index: {}]   ;;  %s5636_s0 = inlined_call_operand.vmem [shape: bf16[16,512], index: 0, kind: input, shape index: {}]   ;;  %s5637_s3 = inlined_call_operand.vmem [shape: bf16[256,256], index: 3, kind: input, shape index: {}]   ;;  %s5638_s2 = inlined_call_operand.vmem [shape: f32[1,256], index: 2, kind: input, shape index: {}]   ;;  %s5639_s5 = inlined_call_operand.vmem [shape: bf16[256,512], index: 5, kind: input, shape index: {}]   ;;  %s5640_s4 = inlined_call_operand.vmem [shape: f32[1,256], index: 4, kind: input, shape index: {}]   ;;  %s5641_s6 = inlined_call_operand.vmem [shape: f32[1,512], index: 6, kind: input, shape index: {}]   ;;  %s5642_s7 = inlined_call_operand.vmem [shape: bf16[512,384], index: 7, kind: input, shape index: {}]   ;;  %s5643_s9 = inlined_call_operand.vmem [shape: s32[16,1], index: 9, kind: input, shape index: {}]   ;;  %s5644_s8 = inlined_call_operand.vmem [shape: f32[1,384], index: 8, kind: input, shape index: {}]   ;;  %s5645_s10 = inlined_call_operand.vmem [shape: f32[16,384], index: 10, kind: output, shape index: {}]  }
   0x1   :  { %v2488_v0 = vld [vmem:[%s5635_s1 + $0x70] sm:$0xf]  ;;  %v3485_v1 = vld [vmem:[%s5635_s1 + $0x74] sm:$0xf0]  ;;  %v2480_v11 = vld [vmem:[%s5635_s1 + $0x60] sm:$0xf] }
   0x2   :  { %v2552_v2 = vld [vmem:[%s5635_s1 + $0xf0] sm:$0xf]  ;;  %v2489_v3 = vor.u32 %v3485_v1, %v2488_v0  ;;  %v3501_v4 = vld [vmem:[%s5635_s1 + $0xf4] sm:$0xf0]  ;;  %v3483_v13 = vld [vmem:[%s5635_s1 + $0x64] sm:$0xf0] }
   0x3   :  { %v2616_v5 = vld [vmem:[%s5635_s1 + $0x170] sm:$0xf]  ;;  %v3517_v6 = vld [vmem:[%s5635_s1 + $0x174] sm:$0xf0]  ;;  %v2553_v7 = vor.u32 %v3501_v4, %v2552_v2  ;;  %v2544_v14 = vld [vmem:[%s5635_s1 + $0xe0] sm:$0xf]  ;;  %v2481_v16 = vor.u32 %v3483_v13, %v2480_v11 }
   0x4   :  { %v2617_v8 = vor.u32 %v3517_v6, %v2616_v5  ;;  %v2680_v9 = vld [vmem:[%s5635_s1 + $0x1f0] sm:$0xf]  ;;  %v3533_v10 = vld [vmem:[%s5635_s1 + $0x1f4] sm:$0xf0]  ;;  %449 = vmatpush.bf16.msra.mxu0 %v2489_v3  ;;  %v3499_v15 = vld [vmem:[%s5635_s1 + $0xe4] sm:$0xf0] }
   0x5   :  { %v2681_v12 = vor.u32 %v3533_v10, %v2680_v9  ;;  %463 = vmatpush.bf16.msra.mxu1 %v2553_v7  ;;  %v2545_v17 = vor.u32 %v3499_v15, %v2544_v14  ;;  %v2608_v18 = vld [vmem:[%s5635_s1 + $0x160] sm:$0xf]  ;;  %v3515_v19 = vld [vmem:[%s5635_s1 + $0x164] sm:$0xf0]  ;;  %v2472_v23 = vld [vmem:[%s5635_s1 + $0x50] sm:$0xf] }
   0x6   :  { %477 = vmatpush.bf16.msra.mxu2 %v2617_v8  ;;  %v2672_v20 = vld [vmem:[%s5635_s1 + $0x1e0] sm:$0xf]  ;;  %v2609_v21 = vor.u32 %v3515_v19, %v2608_v18  ;;  %v3531_v22 = vld [vmem:[%s5635_s1 + $0x1e4] sm:$0xf0]  ;;  %v3481_v24 = vld [vmem:[%s5635_s1 + $0x54] sm:$0xf0] }
   0x7   :  { %491 = vmatpush.bf16.msra.mxu3 %v2681_v12  ;;  %v2673_v25 = vor.u32 %v3531_v22, %v2672_v20  ;;  %v2536_v26 = vld [vmem:[%s5635_s1 + $0xd0] sm:$0xf]  ;;  %v3497_v27 = vld [vmem:[%s5635_s1 + $0xd4] sm:$0xf0]  ;;  %v2473_v29 = vor.u32 %v3481_v24, %v2472_v23  ;;  %v2464_v35 = vld [vmem:[%s5635_s1 + $0x40] sm:$0xf] }
   0x8   :  { %v2600_v28 = vld [vmem:[%s5635_s1 + $0x150] sm:$0xf]  ;;  %450 = vmatpush.bf16.msra.mxu0 %v2481_v16  ;;  %v3513_v30 = vld [vmem:[%s5635_s1 + $0x154] sm:$0xf0]  ;;  %v2537_v33 = vor.u32 %v3497_v27, %v2536_v26  ;;  %v3479_v36 = vld [vmem:[%s5635_s1 + $0x44] sm:$0xf0] }
   0x9   :  { %v2664_v31 = vld [vmem:[%s5635_s1 + $0x1d0] sm:$0xf]  ;;  %v3529_v32 = vld [vmem:[%s5635_s1 + $0x1d4] sm:$0xf0]  ;;  %464 = vmatpush.bf16.msra.mxu1 %v2545_v17  ;;  %v2601_v34 = vor.u32 %v3513_v30, %v2600_v28  ;;  %v2528_v37 = vld [vmem:[%s5635_s1 + $0xc0] sm:$0xf]  ;;  %v2465_v44 = vor.u32 %v3479_v36, %v2464_v35 }
   0xa   :  { %478 = vmatpush.bf16.msra.mxu2 %v2609_v21  ;;  %v2665_v38 = vor.u32 %v3529_v32, %v2664_v31  ;;  %v3495_v39 = vld [vmem:[%s5635_s1 + $0xc4] sm:$0xf0]  ;;  %v2592_v40 = vld [vmem:[%s5635_s1 + $0x140] sm:$0xf]  ;;  %v2456_v47 = vld [vmem:[%s5635_s1 + $0x30] sm:$0xf] }
   0xb   :  { %492 = vmatpush.bf16.msra.mxu3 %v2673_v25  ;;  %v3511_v41 = vld [vmem:[%s5635_s1 + $0x144] sm:$0xf0]  ;;  %v2656_v42 = vld [vmem:[%s5635_s1 + $0x1c0] sm:$0xf]  ;;  %v2529_v45 = vor.u32 %v3495_v39, %v2528_v37  ;;  %v3477_v48 = vld [vmem:[%s5635_s1 + $0x34] sm:$0xf0] }
   0xc   :  { %v3527_v43 = vld [vmem:[%s5635_s1 + $0x1c4] sm:$0xf0]  ;;  %451 = vmatpush.bf16.msra.mxu0 %v2473_v29  ;;  %v2593_v46 = vor.u32 %v3511_v41, %v2592_v40  ;;  %v2520_v49 = vld [vmem:[%s5635_s1 + $0xb0] sm:$0xf]  ;;  %v3493_v51 = vld [vmem:[%s5635_s1 + $0xb4] sm:$0xf0]  ;;  %v2457_v56 = vor.u32 %v3477_v48, %v2456_v47 }
   0xd   :  { %465 = vmatpush.bf16.msra.mxu1 %v2537_v33  ;;  %v2657_v50 = vor.u32 %v3527_v43, %v2656_v42  ;;  %v2584_v52 = vld [vmem:[%s5635_s1 + $0x130] sm:$0xf]  ;;  %v3509_v53 = vld [vmem:[%s5635_s1 + $0x134] sm:$0xf0]  ;;  %v2521_v57 = vor.u32 %v3493_v51, %v2520_v49  ;;  %v2448_v59 = vld [vmem:[%s5635_s1 + $0x20] sm:$0xf] }
   0xe   :  { %479 = vmatpush.bf16.msra.mxu2 %v2601_v34  ;;  %v2648_v54 = vld [vmem:[%s5635_s1 + $0x1b0] sm:$0xf]  ;;  %v3525_v55 = vld [vmem:[%s5635_s1 + $0x1b4] sm:$0xf0]  ;;  %v2585_v58 = vor.u32 %v3509_v53, %v2584_v52  ;;  %v3475_v60 = vld [vmem:[%s5635_s1 + $0x24] sm:$0xf0] }
   0xf   :  { %493 = vmatpush.bf16.msra.mxu3 %v2665_v38  ;;  %v2512_v61 = vld [vmem:[%s5635_s1 + $0xa0] sm:$0xf]  ;;  %v2649_v62 = vor.u32 %v3525_v55, %v2648_v54  ;;  %v3491_v63 = vld [vmem:[%s5635_s1 + $0xa4] sm:$0xf0]  ;;  %v2449_v4 = vor.u32 %v3475_v60, %v2448_v59  ;;  %v2440_v5 = vld [vmem:[%s5635_s1 + $0x10] sm:$0xf] }
  0x10   :  { %452 = vmatpush.bf16.msra.mxu0 %v2465_v44  ;;  %v2576_v0 = vld [vmem:[%s5635_s1 + $0x120] sm:$0xf]  ;;  %v3507_v1 = vld [vmem:[%s5635_s1 + $0x124] sm:$0xf0]  ;;  %v2513_v6 = vor.u32 %v3491_v63, %v2512_v61  ;;  %v3473_v8 = vld [vmem:[%s5635_s1 + $0x14] sm:$0xf0] }
  0x11   :  { %466 = vmatpush.bf16.msra.mxu1 %v2529_v45  ;;  %v2640_v2 = vld [vmem:[%s5635_s1 + $0x1a0] sm:$0xf]  ;;  %v3523_v3 = vld [vmem:[%s5635_s1 + $0x1a4] sm:$0xf0]  ;;  %v2577_v7 = vor.u32 %v3507_v1, %v2576_v0  ;;  %v2504_v9 = vld [vmem:[%s5635_s1 + $0x90] sm:$0xf]  ;;  %v2441_v18 = vor.u32 %v3473_v8, %v2440_v5 }
  0x12   :  { %480 = vmatpush.bf16.msra.mxu2 %v2593_v46  ;;  %v3489_v10 = vld [vmem:[%s5635_s1 + $0x94] sm:$0xf0]  ;;  %v2641_v11 = vor.u32 %v3523_v3, %v2640_v2  ;;  %v2568_v12 = vld [vmem:[%s5635_s1 + $0x110] sm:$0xf]  ;;  %v2432_v16 = vld [vmem:[%s5635_s1] sm:$0xf] }
  0x13   :  { %494 = vmatpush.bf16.msra.mxu3 %v2657_v50  ;;  %v3505_v13 = vld [vmem:[%s5635_s1 + $0x114] sm:$0xf0]  ;;  %v2632_v14 = vld [vmem:[%s5635_s1 + $0x190] sm:$0xf]  ;;  %v3471_v17 = vld [vmem:[%s5635_s1 + $0x4] sm:$0xf0]  ;;  %v2505_v23 = vor.u32 %v3489_v10, %v2504_v9 }
  0x14   :  { %453 = vmatpush.bf16.msra.mxu0 %v2457_v56  ;;  %v3521_v15 = vld [vmem:[%s5635_s1 + $0x194] sm:$0xf0]  ;;  %v2496_v19 = vld [vmem:[%s5635_s1 + $0x80] sm:$0xf]  ;;  %v3487_v20 = vld [vmem:[%s5635_s1 + $0x84] sm:$0xf0]  ;;  %v2569_v24 = vor.u32 %v3505_v13, %v2568_v12  ;;  %v2433_v35 = vor.u32 %v3471_v17, %v2432_v16 }
  0x15   :  { %467 = vmatpush.bf16.msra.mxu1 %v2521_v57  ;;  %v2560_v21 = vld [vmem:[%s5635_s1 + $0x100] sm:$0xf]  ;;  %v3503_v22 = vld [vmem:[%s5635_s1 + $0x104] sm:$0xf0]  ;;  %v3484_v27 = vld [vmem:[%s5635_s1 + $0x74] sm:$0xf]  ;;  %v2633_v28 = vor.u32 %v3521_v15, %v2632_v14  ;;  %v2497_v39 = vor.u32 %v3487_v20, %v2496_v19 }
  0x16   :  { %481 = vmatpush.bf16.msra.mxu2 %v2585_v58  ;;  %v2624_v25 = vld [vmem:[%s5635_s1 + $0x180] sm:$0xf]  ;;  %v3519_v26 = vld [vmem:[%s5635_s1 + $0x184] sm:$0xf0]  ;;  %v2490_v29 = vld [vmem:[%s5635_s1 + $0x78] sm:$0xf0]  ;;  %v2561_v40 = vor.u32 %v3503_v22, %v2560_v21 }
  0x17   :  { %495 = vmatpush.bf16.msra.mxu3 %v2649_v62  ;;  %v3500_v30 = vld [vmem:[%s5635_s1 + $0xf4] sm:$0xf]  ;;  %v2554_v31 = vld [vmem:[%s5635_s1 + $0xf8] sm:$0xf0]  ;;  %v2424_v37 = vld [vmem:[%s5636_s0 + $0x8] sm:$0xf]  ;;  %v2625_v44 = vor.u32 %v3519_v26, %v2624_v25  ;;  %v2493_v45 = vor.u32 %v3484_v27, %v2490_v29 }
  0x18   :  { %454 = vmatpush.bf16.msra.mxu0 %v2449_v4  ;;  %v3516_v32 = vld [vmem:[%s5635_s1 + $0x174] sm:$0xf]  ;;  %v2618_v33 = vld [vmem:[%s5635_s1 + $0x178] sm:$0xf0]  ;;  %v3469_v38 = vld [vmem:[%s5636_s0 + $0x14] sm:$0xf0]  ;;  %v2557_v49 = vor.u32 %v3500_v30, %v2554_v31 }
  0x19   :  { %468 = vmatpush.bf16.msra.mxu1 %v2513_v6  ;;  %v3532_v34 = vld [vmem:[%s5635_s1 + $0x1f4] sm:$0xf]  ;;  %v2682_v36 = vld [vmem:[%s5635_s1 + $0x1f8] sm:$0xf0]  ;;  %v2416_v41 = vld [vmem:[%s5636_s0] sm:$0xf]  ;;  %v2621_v50 = vor.u32 %v3516_v32, %v2618_v33  ;;  %v4052_v55 = vor.u32 %v3469_v38, %v2424_v37 }
  0x1a   :  { %482 = vmatpush.bf16.msra.mxu2 %v2577_v7  ;;  %v3468_v42 = vld [vmem:[%s5636_s0 + $0xc] sm:$0xf0]  ;;  %v3467_v43 = vld [vmem:[%s5636_s0 + $0xc] sm:$0xf]  ;;  %v2426_v46 = vld [vmem:[%s5636_s0 + $0x18] sm:$0xf0]  ;;  %v2685_v54 = vor.u32 %v3532_v34, %v2682_v36 }
  0x1b   :  { %496 = vmatpush.bf16.msra.mxu3 %v2641_v11  ;;  %v3482_v47 = vld [vmem:[%s5635_s1 + $0x64] sm:$0xf]  ;;  %v2482_v48 = vld [vmem:[%s5635_s1 + $0x68] sm:$0xf0]  ;;  %v2418_v53 = vld [vmem:[%s5636_s0 + $0x10] sm:$0xf0]  ;;  %v4063_v59 = vor.u32 %v3468_v42, %v2416_v41  ;;  %v4065_v60 = vor.u32 %v3467_v43, %v2426_v46 }
  0x1c   :  { %455 = vmatpush.bf16.msra.mxu0 %v2441_v18  ;;  %v3498_v51 = vld [vmem:[%s5635_s1 + $0xe4] sm:$0xf]  ;;  %v2546_v56 = vld [vmem:[%s5635_s1 + $0xe8] sm:$0xf0]  ;;  %v2485_v63 = vor.u32 %v3482_v47, %v2482_v48  ;;  %v3480_v3 = vld [vmem:[%s5635_s1 + $0x54] sm:$0xf] }
  0x1d   :  { %469 = vmatpush.bf16.msra.mxu1 %v2505_v23  ;;  %v3466_v52 = vld [vmem:[%s5636_s0 + $0x4] sm:$0xf]  ;;  %v2610_v58 = vld [vmem:[%s5635_s1 + $0x168] sm:$0xf0]  ;;  %v2549_v1 = vor.u32 %v3498_v51, %v2546_v56  ;;  %v2474_v4 = vld [vmem:[%s5635_s1 + $0x58] sm:$0xf0] }
  0x1e   :  { %483 = vmatpush.bf16.msra.mxu2 %v2569_v24  ;;  %v3514_v57 = vld [vmem:[%s5635_s1 + $0x164] sm:$0xf]  ;;  %v2674_v62 = vld [vmem:[%s5635_s1 + $0x1e8] sm:$0xf0]  ;;  %v4073_v0 = vor.u32 %v3466_v52, %v2418_v53  ;;  %v3496_v5 = vld [vmem:[%s5635_s1 + $0xd4] sm:$0xf]  ;;  %v2477_v12 = vor.u32 %v3480_v3, %v2474_v4 }
  0x1f   :  { %497 = vmatpush.bf16.msra.mxu3 %v2633_v28  ;;  %v3530_v61 = vld [vmem:[%s5635_s1 + $0x1e4] sm:$0xf]  ;;  %v2613_v2 = vor.u32 %v3514_v57, %v2610_v58  ;;  %v2538_v7 = vld [vmem:[%s5635_s1 + $0xd8] sm:$0xf0]  ;;  %v3512_v8 = vld [vmem:[%s5635_s1 + $0x154] sm:$0xf] }
  0x20   :  { %456 = vmatpush.bf16.msra.mxu0 %v2433_v35  ;;  %v2677_v6 = vor.u32 %v3530_v61, %v2674_v62  ;;  %v2602_v9 = vld [vmem:[%s5635_s1 + $0x158] sm:$0xf0]  ;;  %v3528_v10 = vld [vmem:[%s5635_s1 + $0x1d4] sm:$0xf]  ;;  %v2541_v13 = vor.u32 %v3496_v5, %v2538_v7  ;;  %v3478_v15 = vld [vmem:[%s5635_s1 + $0x44] sm:$0xf] }
  0x21   :  { %470 = vmatpush.bf16.msra.mxu1 %v2497_v39  ;;  %v2666_v11 = vld [vmem:[%s5635_s1 + $0x1d8] sm:$0xf0]  ;;  %v2605_v14 = vor.u32 %v3512_v8, %v2602_v9  ;;  %v2466_v16 = vld [vmem:[%s5635_s1 + $0x48] sm:$0xf0]  ;;  %v3494_v17 = vld [vmem:[%s5635_s1 + $0xc4] sm:$0xf] }
  0x22   :  { %484 = vmatpush.bf16.msra.mxu2 %v2561_v40  ;;  %v2669_v18 = vor.u32 %v3528_v10, %v2666_v11  ;;  %v2530_v19 = vld [vmem:[%s5635_s1 + $0xc8] sm:$0xf0]  ;;  %v3510_v20 = vld [vmem:[%s5635_s1 + $0x144] sm:$0xf]  ;;  %v2469_v24 = vor.u32 %v3478_v15, %v2466_v16  ;;  %v3476_v27 = vld [vmem:[%s5635_s1 + $0x34] sm:$0xf] }
  0x23   :  { %498 = vmatpush.bf16.msra.mxu3 %v2625_v44  ;;  %457 = vmatmul.bf16.vlgmr.msra.gmra.mxu0 %v4063_v59  ;;  %v2594_v21 = vld [vmem:[%s5635_s1 + $0x148] sm:$0xf0]  ;;  %v3526_v22 = vld [vmem:[%s5635_s1 + $0x1c4] sm:$0xf]  ;;  %v2533_v25 = vor.u32 %v3494_v17, %v2530_v19  ;;  %v2458_v28 = vld [vmem:[%s5635_s1 + $0x38] sm:$0xf0] }
  0x24   :  { %505 = vmatpush.bf16.msrb.mxu0 %v2493_v45  ;;  %471 = vmatmul.bf16.vlgmr.msra.gmra.mxu1 %v4073_v0  ;;  %v2658_v23 = vld [vmem:[%s5635_s1 + $0x1c8] sm:$0xf0]  ;;  %v2597_v26 = vor.u32 %v3510_v20, %v2594_v21  ;;  %v3492_v29 = vld [vmem:[%s5635_s1 + $0xb4] sm:$0xf]  ;;  %v2522_v31 = vld [vmem:[%s5635_s1 + $0xb8] sm:$0xf0]  ;;  %v2461_v36 = vor.u32 %v3476_v27, %v2458_v28 }
  0x25   :  { %519 = vmatpush.bf16.msrb.mxu1 %v2557_v49  ;;  %485 = vmatmul.bf16.vlgmr.msra.gmra.mxu2 %v4052_v55  ;;  %v2661_v30 = vor.u32 %v3526_v22, %v2658_v23  ;;  %v3508_v32 = vld [vmem:[%s5635_s1 + $0x134] sm:$0xf]  ;;  %v2586_v33 = vld [vmem:[%s5635_s1 + $0x138] sm:$0xf0]  ;;  %v2525_v37 = vor.u32 %v3492_v29, %v2522_v31  ;;  %v3474_v39 = vld [vmem:[%s5635_s1 + $0x24] sm:$0xf] }
  0x26   :  { %533 = vmatpush.bf16.msrb.mxu2 %v2621_v50  ;;  %499 = vmatmul.bf16.vlgmr.msra.gmra.mxu3 %v4065_v60  ;;  %v3524_v34 = vld [vmem:[%s5635_s1 + $0x1b4] sm:$0xf]  ;;  %v2650_v35 = vld [vmem:[%s5635_s1 + $0x1b8] sm:$0xf0]  ;;  %v2589_v38 = vor.u32 %v3508_v32, %v2586_v33  ;;  %v2450_v40 = vld [vmem:[%s5635_s1 + $0x28] sm:$0xf0] }
  0x27   :  { %547 = vmatpush.bf16.msrb.mxu3 %v2685_v54  ;;  %v3490_v41 = vld [vmem:[%s5635_s1 + $0xa4] sm:$0xf]  ;;  %v2653_v42 = vor.u32 %v3524_v34, %v2650_v35  ;;  %v2514_v43 = vld [vmem:[%s5635_s1 + $0xa8] sm:$0xf0]  ;;  %v2453_v48 = vor.u32 %v3474_v39, %v2450_v40  ;;  %v3472_v51 = vld [vmem:[%s5635_s1 + $0x14] sm:$0xf] }
  0x28   :  { %506 = vmatpush.bf16.msrb.mxu0 %v2485_v63  ;;  %v3506_v44 = vld [vmem:[%s5635_s1 + $0x124] sm:$0xf]  ;;  %v2578_v45 = vld [vmem:[%s5635_s1 + $0x128] sm:$0xf0]  ;;  %v2517_v49 = vor.u32 %v3490_v41, %v2514_v43  ;;  %v2442_v52 = vld [vmem:[%s5635_s1 + $0x18] sm:$0xf0] }
  0x29   :  { %520 = vmatpush.bf16.msrb.mxu1 %v2549_v1  ;;  %v3522_v46 = vld [vmem:[%s5635_s1 + $0x1a4] sm:$0xf]  ;;  %v2642_v47 = vld [vmem:[%s5635_s1 + $0x1a8] sm:$0xf0]  ;;  %v2581_v50 = vor.u32 %v3506_v44, %v2578_v45  ;;  %v3488_v53 = vld [vmem:[%s5635_s1 + $0x94] sm:$0xf]  ;;  %v2445_v63 = vor.u32 %v3472_v51, %v2442_v52 }
  0x2a   :  { %534 = vmatpush.bf16.msrb.mxu2 %v2613_v2  ;;  %v2645_v54 = vor.u32 %v3522_v46, %v2642_v47  ;;  %v2506_v56 = vld [vmem:[%s5635_s1 + $0x98] sm:$0xf0]  ;;  %v3504_v57 = vld [vmem:[%s5635_s1 + $0x114] sm:$0xf]  ;;  %v3470_v1 = vld [vmem:[%s5635_s1 + $0x4] sm:$0xf] }
  0x2b   :  { %548 = vmatpush.bf16.msrb.mxu3 %v2677_v6  ;;  %v2570_v58 = vld [vmem:[%s5635_s1 + $0x118] sm:$0xf0]  ;;  %v3520_v61 = vld [vmem:[%s5635_s1 + $0x194] sm:$0xf]  ;;  %v2509_v2 = vor.u32 %v3488_v53, %v2506_v56  ;;  %v2434_v4 = vld [vmem:[%s5635_s1 + $0x8] sm:$0xf0] }
  0x2c   :  { %507 = vmatpush.bf16.msrb.mxu0 %v2477_v12  ;;  %v2634_v62 = vld [vmem:[%s5635_s1 + $0x198] sm:$0xf0]  ;;  %v2573_v3 = vor.u32 %v3504_v57, %v2570_v58  ;;  %v3486_v5 = vld [vmem:[%s5635_s1 + $0x84] sm:$0xf]  ;;  %v2498_v6 = vld [vmem:[%s5635_s1 + $0x88] sm:$0xf0] }
  0x2d   :  { %521 = vmatpush.bf16.msrb.mxu1 %v2541_v13  ;;  %v2637_v7 = vor.u32 %v3520_v61, %v2634_v62  ;;  %v3502_v8 = vld [vmem:[%s5635_s1 + $0x104] sm:$0xf]  ;;  %v2562_v9 = vld [vmem:[%s5635_s1 + $0x108] sm:$0xf0]  ;;  %v2744_v12 = vld [vmem:[%s5637_s3 + $0x70] sm:$0xf]  ;;  %v2501_v17 = vor.u32 %v3486_v5, %v2498_v6 }
  0x2e   :  { %535 = vmatpush.bf16.msrb.mxu2 %v2605_v14  ;;  %v3518_v10 = vld [vmem:[%s5635_s1 + $0x184] sm:$0xf]  ;;  %v2626_v11 = vld [vmem:[%s5635_s1 + $0x188] sm:$0xf0]  ;;  %v3549_v13 = vld [vmem:[%s5637_s3 + $0x74] sm:$0xf0]  ;;  %v2437_v14 = vor.u32 %v3470_v1, %v2434_v4 }
  0x2f   :  { %549 = vmatpush.bf16.msrb.mxu3 %v2669_v18  ;;  %v3548_v15 = vld [vmem:[%s5637_s3 + $0x74] sm:$0xf]  ;;  %v2746_v16 = vld [vmem:[%s5637_s3 + $0x78] sm:$0xf0]  ;;  %v2565_v18 = vor.u32 %v3502_v8, %v2562_v9  ;;  %v2629_v19 = vor.u32 %v3518_v10, %v2626_v11  ;;  %v2745_v20 = vor.u32 %v3549_v13, %v2744_v12  ;;  %v2736_v22 = vld [vmem:[%s5637_s3 + $0x60] sm:$0xf] }
  0x30   :  { %508 = vmatpush.bf16.msrb.mxu0 %v2469_v24  ;;  %v2749_v21 = vor.u32 %v3548_v15, %v2746_v16  ;;  %v3547_v23 = vld [vmem:[%s5637_s3 + $0x64] sm:$0xf0]  ;;  %v3546_v24 = vld [vmem:[%s5637_s3 + $0x64] sm:$0xf]  ;;  %v2728_v28 = vld [vmem:[%s5637_s3 + $0x50] sm:$0xf] }
  0x31   :  { %522 = vmatpush.bf16.msrb.mxu1 %v2533_v25  ;;  %v2738_v25 = vld [vmem:[%s5637_s3 + $0x68] sm:$0xf0]  ;;  %v3545_v29 = vld [vmem:[%s5637_s3 + $0x54] sm:$0xf0]  ;;  %v3542_v33 = vld [vmem:[%s5637_s3 + $0x44] sm:$0xf] }
  0x32   :  { %536 = vmatpush.bf16.msrb.mxu2 %v2597_v26  ;;  %v2737_v26 = vor.u32 %v3547_v23, %v2736_v22  ;;  %v2741_v27 = vor.u32 %v3546_v24, %v2738_v25  ;;  %v2729_v31 = vor.u32 %v3545_v29, %v2728_v28  ;;  %v2714_v40 = vld [vmem:[%s5637_s3 + $0x38] sm:$0xf0]  ;;  %v3539_v43 = vld [vmem:[%s5637_s3 + $0x24] sm:$0xf0]  ;;  %v3538_v44 = vld [vmem:[%s5637_s3 + $0x24] sm:$0xf] }
  0x33   :  { %550 = vmatpush.bf16.msrb.mxu3 %v2661_v30  ;;  %v3544_v30 = vld [vmem:[%s5637_s3 + $0x54] sm:$0xf]  ;;  %v2706_v46 = vld [vmem:[%s5637_s3 + $0x28] sm:$0xf0]  ;;  %v2698_v52 = vld [vmem:[%s5637_s3 + $0x18] sm:$0xf0] }
  0x34   :  { %509 = vmatpush.bf16.msrb.mxu0 %v2461_v36  ;;  %v2712_v36 = vld [vmem:[%s5637_s3 + $0x30] sm:$0xf]  ;;  %v2709_v47 = vor.u32 %v3538_v44, %v2706_v46  ;;  %v3535_v56 = vld [vmem:[%s5637_s3 + $0x4] sm:$0xf0]  ;;  %v3534_v57 = vld [vmem:[%s5637_s3 + $0x4] sm:$0xf] }
  0x35   :  { %523 = vmatpush.bf16.msrb.mxu1 %v2525_v37  ;;  %v3541_v37 = vld [vmem:[%s5637_s3 + $0x34] sm:$0xf0]  ;;  %v2690_v61 = vld [vmem:[%s5637_s3 + $0x8] sm:$0xf0]  ;;  %v2808_v62 = vld [vmem:[%s5637_s3 + $0xf0] sm:$0xf] }
  0x36   :  { %537 = vmatpush.bf16.msrb.mxu2 %v2589_v38  ;;  %v3540_v38 = vld [vmem:[%s5637_s3 + $0x34] sm:$0xf]  ;;  %v2713_v39 = vor.u32 %v3541_v37, %v2712_v36  ;;  %v2693_v1 = vor.u32 %v3534_v57, %v2690_v61  ;;  %v2810_v4 = vld [vmem:[%s5637_s3 + $0xf8] sm:$0xf0]  ;;  %v2800_v6 = vld [vmem:[%s5637_s3 + $0xe0] sm:$0xf] }
  0x37   :  { %551 = vmatpush.bf16.msrb.mxu3 %v2653_v42  ;;  %v2717_v41 = vor.u32 %v3540_v38, %v2714_v40  ;;  %v2704_v42 = vld [vmem:[%s5637_s3 + $0x20] sm:$0xf]  ;;  %v3562_v8 = vld [vmem:[%s5637_s3 + $0xe4] sm:$0xf]  ;;  %v2802_v10 = vld [vmem:[%s5637_s3 + $0xe8] sm:$0xf0] }
  0x38   :  { %510 = vmatpush.bf16.msrb.mxu0 %v2453_v48  ;;  %v2705_v45 = vor.u32 %v3539_v43, %v2704_v42  ;;  %v2696_v48 = vld [vmem:[%s5637_s3 + $0x10] sm:$0xf]  ;;  %v2805_v11 = vor.u32 %v3562_v8, %v2802_v10  ;;  %v4350_v12 = vld [vmem:[%s5638_s2] sm:$0x3]  ;;  %v3560_v15 = vld [vmem:[%s5637_s3 + $0xd4] sm:$0xf] }
  0x39   :  { %524 = vmatpush.bf16.msrb.mxu1 %v2517_v49  ;;  %v3537_v49 = vld [vmem:[%s5637_s3 + $0x14] sm:$0xf0]  ;;  %v2792_v13 = vld [vmem:[%s5637_s3 + $0xd0] sm:$0xf]  ;;  %v3558_v22 = vld [vmem:[%s5637_s3 + $0xc4] sm:$0xf] }
  0x3a   :  { %538 = vmatpush.bf16.msrb.mxu2 %v2581_v50  ;;  %v3536_v50 = vld [vmem:[%s5637_s3 + $0x14] sm:$0xf]  ;;  %v2697_v51 = vor.u32 %v3537_v49, %v2696_v48  ;;  %v2786_v25 = vld [vmem:[%s5637_s3 + $0xc8] sm:$0xf0]  ;;  %v2776_v29 = vld [vmem:[%s5637_s3 + $0xb0] sm:$0xf] }
  0x3b   :  { %552 = vmatpush.bf16.msrb.mxu3 %v2645_v54  ;;  %v2701_v53 = vor.u32 %v3536_v50, %v2698_v52  ;;  %v2688_v54 = vld [vmem:[%s5637_s3] sm:$0xf]  ;;  %v2789_v28 = vor.u32 %v3558_v22, %v2786_v25  ;;  %v3554_v36 = vld [vmem:[%s5637_s3 + $0xa4] sm:$0xf]  ;;  %v2770_v40 = vld [vmem:[%s5637_s3 + $0xa8] sm:$0xf0] }
  0x3c   :  { %511 = vmatpush.bf16.msrb.mxu0 %v2445_v63  ;;  %v2689_v58 = vor.u32 %v3535_v56, %v2688_v54  ;;  %v3565_v63 = vld [vmem:[%s5637_s3 + $0xf4] sm:$0xf0]  ;;  %v2773_v43 = vor.u32 %v3554_v36, %v2770_v40  ;;  %v2762_v50 = vld [vmem:[%s5637_s3 + $0x98] sm:$0xf0]  ;;  %v2752_v56 = vld [vmem:[%s5637_s3 + $0x80] sm:$0xf] }
  0x3d   :  { %525 = vmatpush.bf16.msrb.mxu1 %v2509_v2  ;;  %v2809_v2 = vor.u32 %v3565_v63, %v2808_v62  ;;  %v3553_v46 = vld [vmem:[%s5637_s3 + $0x94] sm:$0xf0]  ;;  %v3551_v57 = vld [vmem:[%s5637_s3 + $0x84] sm:$0xf0]  ;;  %v3588_v40 = vld [vmem:[%s5639_s5 + $0xac] sm:$0xf0] }
  0x3e   :  { %539 = vmatpush.bf16.msrb.mxu2 %v2573_v3  ;;  %v3564_v3 = vld [vmem:[%s5637_s3 + $0xf4] sm:$0xf]  ;;  %v2753_v63 = vor.u32 %v3551_v57, %v2752_v56 }
  0x3f   :  { %553 = vmatpush.bf16.msrb.mxu3 %v2637_v7  ;;  %v2813_v5 = vor.u32 %v3564_v3, %v2810_v4  ;;  %v3563_v7 = vld [vmem:[%s5637_s3 + $0xe4] sm:$0xf0]  ;;  %v2882_v56 = vld [vmem:[%s5639_s5 + $0x90] sm:$0xf0] }
  0x40   :  { %512 = vmatpush.bf16.msrb.mxu0 %v2437_v14  ;;  %v2801_v9 = vor.u32 %v3563_v7, %v2800_v6  ;;  %v3561_v14 = vld [vmem:[%s5637_s3 + $0xd4] sm:$0xf0] }
  0x41   :  { %526 = vmatpush.bf16.msrb.mxu1 %v2501_v17  ;;  %v2793_v16 = vor.u32 %v3561_v14, %v2792_v13  ;;  %v2794_v17 = vld [vmem:[%s5637_s3 + $0xd8] sm:$0xf0] }
  0x42   :  { %540 = vmatpush.bf16.msrb.mxu2 %v2565_v18  ;;  %v105_v18 = vperm.slane %v4350_v12, 0 }
  0x43   :  { %554 = vmatpush.bf16.msrb.mxu3 %v2629_v19  ;;  %513 = vmatmul.bf16.vlgmr.msrb.gmra.mxu0 %v4063_v59  ;;  %v2730_v59 = vld [vmem:[%s5637_s3 + $0x58] sm:$0xf0]  ;;  %v2797_v19 = vor.u32 %v3560_v15, %v2794_v17 }
  0x44   :  { %765 = vmatpush.bf16.msra.mxu0 %v2745_v20  ;;  %527 = vmatmul.bf16.vlgmr.msrb.gmra.mxu1 %v4073_v0  ;;  %v2733_v32 = vor.u32 %v3544_v30, %v2730_v59  ;;  %v3543_v0 = vld [vmem:[%s5637_s3 + $0x44] sm:$0xf0]  ;;  %v2784_v20 = vld [vmem:[%s5637_s3 + $0xc0] sm:$0xf]  ;;  %v3557_v30 = vld [vmem:[%s5637_s3 + $0xb4] sm:$0xf0] }
  0x45   :  { %541 = vmatmul.bf16.vlgmr.msrb.gmra.mxu2 %v4052_v55  ;;  %v2720_v55 = vld [vmem:[%s5637_s3 + $0x40] sm:$0xf]  ;;  %779 = vmatpush.bf16.msra.mxu1 %v2809_v2  ;;  %v3556_v59 = vld [vmem:[%s5637_s3 + $0xb4] sm:$0xf] }
  0x46   :  { %793 = vmatpush.bf16.msra.mxu2 %v2749_v21  ;;  %555 = vmatmul.bf16.vlgmr.msrb.gmra.mxu3 %v4065_v60  ;;  %v2721_v34 = vor.u32 %v3543_v0, %v2720_v55  ;;  %v2722_v60 = vld [vmem:[%s5637_s3 + $0x48] sm:$0xf0]  ;;  %v3559_v21 = vld [vmem:[%s5637_s3 + $0xc4] sm:$0xf0]  ;;  %v2778_v55 = vld [vmem:[%s5637_s3 + $0xb8] sm:$0xf0] }
  0x47   :  { %v2725_v35 = vor.u32 %v3542_v33, %v2722_v60  ;;  %807 = vmatpush.bf16.msra.mxu3 %v2813_v5  ;;  %v2785_v24 = vor.u32 %v3559_v21, %v2784_v20  ;;  %v2781_v33 = vor.u32 %v3556_v59, %v2778_v55  ;;  %v2768_v60 = vld [vmem:[%s5637_s3 + $0xa0] sm:$0xf]  ;;  %v106_v5 = vperm.slane %v4350_v12, 1 }
  0x48   :  { %766 = vmatpush.bf16.msra.mxu0 %v2737_v26  ;;  %v2928_v12 = vld [vmem:[%s5639_s5 + $0xe0] sm:$0xf] }
  0x49   :  { %780 = vmatpush.bf16.msra.mxu1 %v2801_v9  ;;  %v2912_v59 = vld [vmem:[%s5639_s5 + $0xc0] sm:$0xf] }
  0x4a   :  { %794 = vmatpush.bf16.msra.mxu2 %v2741_v27 }
  0x4b   :  { %808 = vmatpush.bf16.msra.mxu3 %v2805_v11 }
  0x4c   :  { %767 = vmatpush.bf16.msra.mxu0 %v2729_v31 }
  0x4d   :  { %781 = vmatpush.bf16.msra.mxu1 %v2793_v16 }
  0x4e   :  { %795 = vmatpush.bf16.msra.mxu2 %v2733_v32  ;;  %v2777_v32 = vor.u32 %v3557_v30, %v2776_v29  ;;  %v2930_v29 = vld [vmem:[%s5639_s5 + $0xf0] sm:$0xf0] }
  0x4f   :  { %809 = vmatpush.bf16.msra.mxu3 %v2797_v19 }
  0x50   :  { %768 = vmatpush.bf16.msra.mxu0 %v2721_v34 }
  0x51   :  { %782 = vmatpush.bf16.msra.mxu1 %v2785_v24 }
  0x52   :  { %796 = vmatpush.bf16.msra.mxu2 %v2725_v35  ;;  %v3555_v35 = vld [vmem:[%s5637_s3 + $0xa4] sm:$0xf0] }
  0x53   :  { %810 = vmatpush.bf16.msra.mxu3 %v2789_v28 }
  0x54   :  { %769 = vmatpush.bf16.msra.mxu0 %v2713_v39  ;;  %v2769_v39 = vor.u32 %v3555_v35, %v2768_v60  ;;  %v3628_v60 = vld [vmem:[%s5639_s5 + $0x1ec] sm:$0xf0]  ;;  %v3626_v35 = vld [vmem:[%s5639_s5 + $0x1e4] sm:$0xf] }
  0x55   :  { %783 = vmatpush.bf16.msra.mxu1 %v2777_v32  ;;  %v3590_v32 = vld [vmem:[%s5639_s5 + $0xc4] sm:$0xf] }
  0x56   :  { %797 = vmatpush.bf16.msra.mxu2 %v2717_v41 }
  0x57   :  { %811 = vmatpush.bf16.msra.mxu3 %v2781_v33 }
  0x58   :  { %770 = vmatpush.bf16.msra.mxu0 %v2705_v45  ;;  %v2760_v45 = vld [vmem:[%s5637_s3 + $0x90] sm:$0xf] }
  0x59   :  { %784 = vmatpush.bf16.msra.mxu1 %v2769_v39  ;;  %v2761_v49 = vor.u32 %v3553_v46, %v2760_v45  ;;  %v2896_v39 = vld [vmem:[%s5639_s5 + $0xa0] sm:$0xf]  ;;  %v3624_v46 = vld [vmem:[%s5639_s5 + $0x1cc] sm:$0xf0] }
  0x5a   :  { %798 = vmatpush.bf16.msra.mxu2 %v2709_v47  ;;  %v3552_v47 = vld [vmem:[%s5637_s3 + $0x94] sm:$0xf]  ;;  %v3040_v45 = vld [vmem:[%s5639_s5 + $0x1c0] sm:$0xf] }
  0x5b   :  { %812 = vmatpush.bf16.msra.mxu3 %v2773_v43  ;;  %v2765_v52 = vor.u32 %v3552_v47, %v2762_v50  ;;  %v2898_v43 = vld [vmem:[%s5639_s5 + $0xb0] sm:$0xf0]  ;;  %v3622_v47 = vld [vmem:[%s5639_s5 + $0x1c4] sm:$0xf]  ;;  %v2880_v50 = vld [vmem:[%s5639_s5 + $0x80] sm:$0xf] }
  0x5c   :  { %771 = vmatpush.bf16.msra.mxu0 %v2697_v51 }
  0x5d   :  { %785 = vmatpush.bf16.msra.mxu1 %v2761_v49  ;;  %v3042_v49 = vld [vmem:[%s5639_s5 + $0x1d0] sm:$0xf0] }
  0x5e   :  { %799 = vmatpush.bf16.msra.mxu2 %v2701_v53 }
  0x5f   :  { %813 = vmatpush.bf16.msra.mxu3 %v2765_v52  ;;  %v3045_v52 = vor.u32 %v3622_v47, %v3042_v49  ;;  %v3604_v47 = vld [vmem:[%s5639_s5 + $0x12c] sm:$0xf0] }
  0x60   :  { %772 = vmatpush.bf16.msra.mxu0 %v2689_v58  ;;  %v3550_v58 = vld [vmem:[%s5637_s3 + $0x84] sm:$0xf] }
  0x61   :  { %786 = vmatpush.bf16.msra.mxu1 %v2753_v63 }
  0x62   :  { %800 = vmatpush.bf16.msra.mxu2 %v2693_v1  ;;  %v2754_v1 = vld [vmem:[%s5637_s3 + $0x88] sm:$0xf0] }
  0x63   :  { %v2757_v2 = vor.u32 %v3550_v58, %v2754_v1  ;;  %v3024_v58 = vld [vmem:[%s5639_s5 + $0x1a0] sm:$0xf]  ;;  %v3026_v1 = vld [vmem:[%s5639_s5 + $0x1b0] sm:$0xf0] }
  0x65   :  { %814 = vmatpush.bf16.msra.mxu3 %v2757_v2 }
  0xa0   :  { %v458_v23 = vpop.f32.mrf.mxu0 }
  0xa1   :  { %v459_v26 = vadd.f32 %v458_v23, %v105_v18  ;;  %v472_v27 = vpop.f32.mrf.mxu1 }
  0xa3   :  { %v473_v31 = vadd.f32 %v472_v27, %v459_v26  ;;  %v3596_v26 = vld [vmem:[%s5639_s5 + $0xec] sm:$0xf0]  ;;  %v3594_v27 = vld [vmem:[%s5639_s5 + $0xe4] sm:$0xf] }
  0xa4   :  { %v2929_v28 = vor.u32 %v3596_v26, %v2928_v12  ;;  %v2933_v30 = vor.u32 %v3594_v27, %v2930_v29  ;;  %v2994_v12 = vld [vmem:[%s5639_s5 + $0x170] sm:$0xf0]  ;;  %v2832_v26 = vld [vmem:[%s5639_s5 + $0x20] sm:$0xf]  ;;  %v3572_v27 = vld [vmem:[%s5639_s5 + $0x2c] sm:$0xf0] }
  0xa5   :  { %v3570_v29 = vld [vmem:[%s5639_s5 + $0x24] sm:$0xf] }
  0xa6   :  { %1221 = vmatpush.bf16.msrb.mxu0 %v2929_v28  ;;  %1249 = vmatpush.bf16.msrb.mxu2 %v2933_v30  ;;  %v2834_v30 = vld [vmem:[%s5639_s5 + $0x30] sm:$0xf0] }
  0xa8   :  { %v486_v0 = vpop.f32.mrf.mxu2  ;;  %v460_v38 = vpop.f32.mrf.mxu0 }
  0xa9   :  { %v500_v34 = vpop.f32.mrf.mxu3  ;;  %v487_v37 = vadd.f32 %v486_v0, %v473_v31  ;;  %v461_v41 = vadd.f32 %v460_v38, %v105_v18  ;;  %v474_v42 = vpop.f32.mrf.mxu1  ;;  %v3592_v31 = vld [vmem:[%s5639_s5 + $0xcc] sm:$0xf0]  ;;  %v2914_v0 = vld [vmem:[%s5639_s5 + $0xd0] sm:$0xf0] }
  0xaa   :  { %v2913_v55 = vor.u32 %v3592_v31, %v2912_v59  ;;  %v2917_v33 = vor.u32 %v3590_v32, %v2914_v0  ;;  %v2976_v59 = vld [vmem:[%s5639_s5 + $0x140] sm:$0xf]  ;;  %v2833_v31 = vor.u32 %v3572_v27, %v2832_v26  ;;  %v3608_v32 = vld [vmem:[%s5639_s5 + $0x14c] sm:$0xf0]  ;;  %v2978_v0 = vld [vmem:[%s5639_s5 + $0x150] sm:$0xf0] }
  0xab   :  { %v475_v44 = vadd.f32 %v474_v42, %v461_v41  ;;  %v501_v48 = vadd.f32 %v500_v34, %v487_v37  ;;  %v3056_v34 = vld [vmem:[%s5639_s5 + $0x1e0] sm:$0xf]  ;;  %v3058_v37 = vld [vmem:[%s5639_s5 + $0x1f0] sm:$0xf0]  ;;  %v3586_v41 = vld [vmem:[%s5639_s5 + $0xa4] sm:$0xf]  ;;  %v2897_v42 = vor.u32 %v3588_v40, %v2896_v39 }
  0xac   :  { %1222 = vmatpush.bf16.msrb.mxu0 %v2913_v55  ;;  %v3057_v36 = vor.u32 %v3628_v60, %v3056_v34  ;;  %1250 = vmatpush.bf16.msrb.mxu2 %v2917_v33  ;;  %v3061_v38 = vor.u32 %v3626_v35, %v3058_v37  ;;  %v3606_v55 = vld [vmem:[%s5639_s5 + $0x144] sm:$0xf]  ;;  %v2837_v33 = vor.u32 %v3570_v29, %v2834_v30  ;;  %v2816_v34 = vld [vmem:[%s5639_s5] sm:$0xf]  ;;  %v3568_v60 = vld [vmem:[%s5639_s5 + $0xc] sm:$0xf0] }
  0xad   :  { %v561_v61 = vmax.f32 %v501_v48, 0.0  ;;  %v3041_v48 = vor.u32 %v3624_v46, %v3040_v45  ;;  %v2977_v35 = vor.u32 %v3608_v32, %v2976_v59  ;;  %v2818_v37 = vld [vmem:[%s5639_s5 + $0x10] sm:$0xf0]  ;;  %v2817_v39 = vor.u32 %v3568_v60, %v2816_v34  ;;  %v2938_v45 = vld [vmem:[%s5639_s5 + $0xf8] sm:$0xf0] }
  0xae   :  { %1235 = vmatpush.bf16.msrb.mxu1 %v3057_v36  ;;  %1263 = vmatpush.bf16.msrb.mxu3 %v3061_v38  ;;  %v3566_v36 = vld [vmem:[%s5639_s5 + $0x4] sm:$0xf]  ;;  %v2981_v38 = vor.u32 %v3606_v55, %v2978_v0  ;;  %v2960_v46 = vld [vmem:[%s5639_s5 + $0x120] sm:$0xf]  ;;  %v2890_v27 = vld [vmem:[%s5639_s5 + $0x98] sm:$0xf0] }
  0xaf   :  { %v2821_v40 = vor.u32 %v3566_v36, %v2818_v37  ;;  %v2961_v49 = vor.u32 %v3604_v47, %v2960_v46  ;;  %v3032_v29 = vld [vmem:[%s5639_s5 + $0x1a8] sm:$0xf]  ;;  %v3621_v30 = vld [vmem:[%s5639_s5 + $0x1b4] sm:$0xf0]  ;;  %v3619_v59 = vld [vmem:[%s5639_s5 + $0x1ac] sm:$0xf] }
  0xb0   :  { %v488_v51 = vpop.f32.mrf.mxu2  ;;  %1223 = vmatpush.bf16.msrb.mxu0 %v2897_v42  ;;  %v3597_v42 = vld [vmem:[%s5639_s5 + $0xf4] sm:$0xf0]  ;;  %v3034_v32 = vld [vmem:[%s5639_s5 + $0x1b8] sm:$0xf0]  ;;  %v2872_v0 = vld [vmem:[%s5639_s5 + $0x68] sm:$0xf] }
  0xb1   :  { %v489_v53 = vadd.f32 %v488_v51, %v475_v44  ;;  %v502_v54 = vpop.f32.mrf.mxu3  ;;  %v2901_v44 = vor.u32 %v3586_v41, %v2898_v43  ;;  %v3584_v51 = vld [vmem:[%s5639_s5 + $0x8c] sm:$0xf0]  ;;  %v2936_v41 = vld [vmem:[%s5639_s5 + $0xe8] sm:$0xf]  ;;  %v3595_v43 = vld [vmem:[%s5639_s5 + $0xec] sm:$0xf]  ;;  %v3037_v55 = vor.u32 %v3619_v59, %v3034_v32 }
  0xb2   :  { %1236 = vmatpush.bf16.msrb.mxu1 %v3041_v48  ;;  %1264 = vmatpush.bf16.msrb.mxu3 %v3045_v52  ;;  %v2941_v48 = vor.u32 %v3595_v43, %v2938_v45  ;;  %v3579_v34 = vld [vmem:[%s5639_s5 + $0x6c] sm:$0xf]  ;;  %v3016_v37 = vld [vmem:[%s5639_s5 + $0x188] sm:$0xf]  ;;  %v2858_v47 = vld [vmem:[%s5639_s5 + $0x58] sm:$0xf0] }
  0xb3   :  { %v503_v62 = vadd.f32 %v502_v54, %v489_v53  ;;  %1251 = vmatpush.bf16.msrb.mxu2 %v2901_v44  ;;  %v2881_v53 = vor.u32 %v3584_v51, %v2880_v50  ;;  %v3582_v54 = vld [vmem:[%s5639_s5 + $0x84] sm:$0xf]  ;;  %v2937_v44 = vor.u32 %v3597_v42, %v2936_v41  ;;  %v2962_v51 = vld [vmem:[%s5639_s5 + $0x130] sm:$0xf0]  ;;  %v3018_v41 = vld [vmem:[%s5639_s5 + $0x198] sm:$0xf0] }
  0xb4   :  { %v2885_v57 = vor.u32 %v3582_v54, %v2882_v56  ;;  %v3602_v50 = vld [vmem:[%s5639_s5 + $0x124] sm:$0xf]  ;;  %v3593_v54 = vld [vmem:[%s5639_s5 + $0xd4] sm:$0xf0]  ;;  %v3591_v56 = vld [vmem:[%s5639_s5 + $0xcc] sm:$0xf] }
  0xb5   :  { %v563_v3 = vmax.f32 %v503_v62, 0.0  ;;  %v3618_v62 = vld [vmem:[%s5639_s5 + $0x1a4] sm:$0xf]  ;;  %1224 = vmatpush.bf16.msrb.mxu0 %v2881_v53  ;;  %v2965_v52 = vor.u32 %v3602_v50, %v2962_v51  ;;  %v2920_v53 = vld [vmem:[%s5639_s5 + $0xc8] sm:$0xf] }
  0xb6   :  { %v3029_v2 = vor.u32 %v3618_v62, %v3026_v1  ;;  %v3600_v62 = vld [vmem:[%s5639_s5 + $0x10c] sm:$0xf0]  ;;  %v2856_v43 = vld [vmem:[%s5639_s5 + $0x48] sm:$0xf]  ;;  %v3575_v45 = vld [vmem:[%s5639_s5 + $0x4c] sm:$0xf] }
  0xb7   :  { %v565_v4 = vpack.c.bf16 %v563_v3, %v561_v61  ;;  %v3620_v61 = vld [vmem:[%s5639_s5 + $0x1ac] sm:$0xf0]  ;;  %1252 = vmatpush.bf16.msrb.mxu2 %v2885_v57  ;;  %v2864_v3 = vld [vmem:[%s5639_s5 + $0x60] sm:$0xf]  ;;  %v2921_v57 = vor.u32 %v3593_v54, %v2920_v53  ;;  %v3613_v50 = vld [vmem:[%s5639_s5 + $0x174] sm:$0xf0] }
  0xb8   :  { %v3025_v63 = vor.u32 %v3620_v61, %v3024_v58  ;;  %1265 = vmatpush.bf16.msrb.mxu3 %v3029_v2  ;;  %v2922_v58 = vld [vmem:[%s5639_s5 + $0xd8] sm:$0xf0]  ;;  %v2944_v61 = vld [vmem:[%s5639_s5 + $0x100] sm:$0xf]  ;;  %v3598_v2 = vld [vmem:[%s5639_s5 + $0x104] sm:$0xf] }
  0xb9   :  { %773 = vmatmul.bf16.vlgmr.msra.gmra.mxu0 %v565_v4  ;;  %801 = vmatmul.bf16.vlgmr.msra.gmra.mxu2 %v565_v4  ;;  %v3580_v4 = vld [vmem:[%s5639_s5 + $0x6c] sm:$0xf0]  ;;  %v2945_v1 = vor.u32 %v3600_v62, %v2944_v61  ;;  %v3611_v51 = vld [vmem:[%s5639_s5 + $0x16c] sm:$0xf]  ;;  %v3002_v53 = vld [vmem:[%s5639_s5 + $0x178] sm:$0xf0] }
  0xba   :  { %1237 = vmatpush.bf16.msrb.mxu1 %v3025_v63  ;;  %v2925_v63 = vor.u32 %v3591_v56, %v2922_v58  ;;  %v2840_v54 = vld [vmem:[%s5639_s5 + $0x28] sm:$0xf]  ;;  %v3573_v56 = vld [vmem:[%s5639_s5 + $0x34] sm:$0xf0]  ;;  %v3571_v61 = vld [vmem:[%s5639_s5 + $0x2c] sm:$0xf] }
  0xbb   :  { %v2841_v58 = vor.u32 %v3573_v56, %v2840_v54  ;;  %v2842_v62 = vld [vmem:[%s5639_s5 + $0x38] sm:$0xf0]  ;;  %v3156_v54 = vld [vmem:[%s5642_s7 + $0xa8] sm:$0xf]  ;;  %v3652_v56 = vld [vmem:[%s5642_s7 + $0xb0] sm:$0xf0] }
  0xc0   :  { %v514_v6 = vpop.f32.mrf.mxu0 }
  0xc1   :  { %v528_v7 = vpop.f32.mrf.mxu1  ;;  %v515_v8 = vadd.f32 %v514_v6, %v106_v5  ;;  %v2865_v6 = vor.u32 %v3580_v4, %v2864_v3  ;;  %v2946_v3 = vld [vmem:[%s5639_s5 + $0x110] sm:$0xf0]  ;;  %v3064_v4 = vld [vmem:[%s5639_s5 + $0x1e8] sm:$0xf] }
  0xc3   :  { %v529_v10 = vadd.f32 %v528_v7, %v515_v8  ;;  %v2866_v7 = vld [vmem:[%s5639_s5 + $0x70] sm:$0xf0]  ;;  %v3008_v8 = vld [vmem:[%s5639_s5 + $0x180] sm:$0xf]  ;;  %1225 = vmatpush.bf16.msrb.mxu0 %v2865_v6  ;;  %v3629_v6 = vld [vmem:[%s5639_s5 + $0x1f4] sm:$0xf0] }
  0xc8   :  { %v542_v9 = vpop.f32.mrf.mxu2  ;;  %v516_v13 = vpop.f32.mrf.mxu0 }
  0xc9   :  { %v556_v11 = vpop.f32.mrf.mxu3  ;;  %v517_v14 = vadd.f32 %v516_v13, %v106_v5  ;;  %v543_v15 = vadd.f32 %v542_v9, %v529_v10  ;;  %v530_v16 = vpop.f32.mrf.mxu1  ;;  %v3578_v5 = vld [vmem:[%s5639_s5 + $0x64] sm:$0xf]  ;;  %v3616_v9 = vld [vmem:[%s5639_s5 + $0x18c] sm:$0xf0] }
  0xca   :  { %v2869_v10 = vor.u32 %v3578_v5, %v2866_v7  ;;  %v3614_v13 = vld [vmem:[%s5639_s5 + $0x184] sm:$0xf]  ;;  %v2949_v5 = vor.u32 %v3598_v2, %v2946_v3  ;;  %v3627_v7 = vld [vmem:[%s5639_s5 + $0x1ec] sm:$0xf]  ;;  %v3609_v2 = vld [vmem:[%s5639_s5 + $0x154] sm:$0xf0] }
  0xcb   :  { %v531_v17 = vadd.f32 %v530_v16, %v517_v14  ;;  %v557_v19 = vadd.f32 %v556_v11, %v543_v15  ;;  %v3009_v11 = vor.u32 %v3616_v9, %v3008_v8  ;;  %v3010_v14 = vld [vmem:[%s5639_s5 + $0x190] sm:$0xf0]  ;;  %v2848_v15 = vld [vmem:[%s5639_s5 + $0x40] sm:$0xf]  ;;  %v3066_v8 = vld [vmem:[%s5639_s5 + $0x1f8] sm:$0xf0]  ;;  %v3065_v9 = vor.u32 %v3629_v6, %v3064_v4 }
  0xcc   :  { %v3013_v16 = vor.u32 %v3614_v13, %v3010_v14  ;;  %1253 = vmatpush.bf16.msrb.mxu2 %v2869_v10  ;;  %v3069_v10 = vor.u32 %v3627_v7, %v3066_v8  ;;  %v3589_v13 = vld [vmem:[%s5639_s5 + $0xb4] sm:$0xf0]  ;;  %v3587_v14 = vld [vmem:[%s5639_s5 + $0xac] sm:$0xf]  ;;  %v2986_v4 = vld [vmem:[%s5639_s5 + $0x158] sm:$0xf0] }
  0xcd   :  { %v562_v23 = vmax.f32 %v557_v19, 0.0  ;;  %v2850_v19 = vld [vmem:[%s5639_s5 + $0x50] sm:$0xf0]  ;;  %1238 = vmatpush.bf16.msrb.mxu1 %v3009_v11  ;;  %v2904_v11 = vld [vmem:[%s5639_s5 + $0xa8] sm:$0xf] }
  0xce   :  { %1266 = vmatpush.bf16.msrb.mxu3 %v3013_v16  ;;  %v2906_v16 = vld [vmem:[%s5639_s5 + $0xb8] sm:$0xf0]  ;;  %v3607_v3 = vld [vmem:[%s5639_s5 + $0x14c] sm:$0xf]  ;;  %v2824_v7 = vld [vmem:[%s5639_s5 + $0x8] sm:$0xf] }
  0xcf   :  { %v2989_v6 = vor.u32 %v3607_v3, %v2986_v4  ;;  %v3569_v8 = vld [vmem:[%s5639_s5 + $0x14] sm:$0xf0]  ;;  %v3444_v4 = vld [vmem:[%s5642_s7 + $0x2e8] sm:$0xf] }
  0xd0   :  { %v544_v18 = vpop.f32.mrf.mxu2 }
  0xd1   :  { %v545_v20 = vadd.f32 %v544_v18, %v531_v17  ;;  %v558_v21 = vpop.f32.mrf.mxu3  ;;  %v3576_v17 = vld [vmem:[%s5639_s5 + $0x4c] sm:$0xf0]  ;;  %v3574_v18 = vld [vmem:[%s5639_s5 + $0x44] sm:$0xf] }
  0xd3   :  { %v559_v22 = vadd.f32 %v558_v21, %v545_v20  ;;  %v2849_v20 = vor.u32 %v3576_v17, %v2848_v15  ;;  %v2853_v21 = vor.u32 %v3574_v18, %v2850_v19  ;;  %v2905_v15 = vor.u32 %v3589_v13, %v2904_v11  ;;  %v3048_v18 = vld [vmem:[%s5639_s5 + $0x1c8] sm:$0xf]  ;;  %v3625_v19 = vld [vmem:[%s5639_s5 + $0x1d4] sm:$0xf0]  ;;  %v2826_v11 = vld [vmem:[%s5639_s5 + $0x18] sm:$0xf0] }
  0xd4   :  { %v2909_v17 = vor.u32 %v3587_v14, %v2906_v16  ;;  %v2968_v13 = vld [vmem:[%s5639_s5 + $0x128] sm:$0xf]  ;;  %v3605_v14 = vld [vmem:[%s5639_s5 + $0x134] sm:$0xf0] }
  0xd5   :  { %v564_v24 = vmax.f32 %v559_v22, 0.0  ;;  %v2992_v22 = vld [vmem:[%s5639_s5 + $0x160] sm:$0xf]  ;;  %1226 = vmatpush.bf16.msrb.mxu0 %v2849_v20  ;;  %1254 = vmatpush.bf16.msrb.mxu2 %v2853_v21  ;;  %v3623_v20 = vld [vmem:[%s5639_s5 + $0x1cc] sm:$0xf]  ;;  %v3049_v21 = vor.u32 %v3625_v19, %v3048_v18  ;;  %v2969_v19 = vor.u32 %v3605_v14, %v2968_v13 }
  0xd6   :  { %v2970_v18 = vld [vmem:[%s5639_s5 + $0x138] sm:$0xf0]  ;;  %v3336_v14 = vld [vmem:[%s5642_s7 + $0x210] sm:$0xf] }
  0xd7   :  { %v566_v25 = vpack.c.bf16 %v564_v24, %v562_v23  ;;  %v3612_v23 = vld [vmem:[%s5639_s5 + $0x16c] sm:$0xf0]  ;;  %v3610_v24 = vld [vmem:[%s5639_s5 + $0x164] sm:$0xf]  ;;  %v3673_v13 = vld [vmem:[%s5642_s7 + $0x158] sm:$0xf0] }
  0xd8   :  { %v2997_v28 = vor.u32 %v3610_v24, %v2994_v12  ;;  %v2888_v24 = vld [vmem:[%s5639_s5 + $0x88] sm:$0xf]  ;;  %v3583_v12 = vld [vmem:[%s5639_s5 + $0x8c] sm:$0xf] }
  0xd9   :  { %787 = vmatmul.bf16.vlgmr.msra.gmra.mxu1 %v566_v25  ;;  %815 = vmatmul.bf16.vlgmr.msra.gmra.mxu3 %v566_v25  ;;  %v2993_v25 = vor.u32 %v3612_v23, %v2992_v22  ;;  %v3050_v22 = vld [vmem:[%s5639_s5 + $0x1d8] sm:$0xf0] }
  0xda   :  { %1267 = vmatpush.bf16.msrb.mxu3 %v2997_v28  ;;  %1227 = vmatpush.bf16.msrb.mxu0 %v2833_v31  ;;  %v3053_v23 = vor.u32 %v3623_v20, %v3050_v22  ;;  %v2893_v28 = vor.u32 %v3583_v12, %v2890_v27  ;;  %v3033_v31 = vor.u32 %v3621_v30, %v3032_v29  ;;  %v2952_v22 = vld [vmem:[%s5639_s5 + $0x108] sm:$0xf]  ;;  %v2954_v27 = vld [vmem:[%s5639_s5 + $0x118] sm:$0xf0] }
  0xdb   :  { %1239 = vmatpush.bf16.msrb.mxu1 %v2993_v25  ;;  %1255 = vmatpush.bf16.msrb.mxu2 %v2837_v33  ;;  %v3585_v25 = vld [vmem:[%s5639_s5 + $0x94] sm:$0xf0] }
  0xdc   :  { %v2889_v26 = vor.u32 %v3585_v25, %v2888_v24  ;;  %v3581_v33 = vld [vmem:[%s5639_s5 + $0x74] sm:$0xf0]  ;;  %v3599_v24 = vld [vmem:[%s5639_s5 + $0x10c] sm:$0xf] }
  0xdd   :  { %v2873_v60 = vor.u32 %v3581_v33, %v2872_v0  ;;  %v2957_v29 = vor.u32 %v3599_v24, %v2954_v27 }
  0xde   :  { %1268 = vmatpush.bf16.msrb.mxu3 %v2981_v38  ;;  %1228 = vmatpush.bf16.msrb.mxu0 %v2817_v39  ;;  %v3617_v38 = vld [vmem:[%s5639_s5 + $0x194] sm:$0xf0]  ;;  %v3615_v39 = vld [vmem:[%s5639_s5 + $0x18c] sm:$0xf] }
  0xdf   :  { %1240 = vmatpush.bf16.msrb.mxu1 %v2977_v35  ;;  %1256 = vmatpush.bf16.msrb.mxu2 %v2821_v40  ;;  %v2874_v35 = vld [vmem:[%s5639_s5 + $0x78] sm:$0xf0]  ;;  %v3017_v40 = vor.u32 %v3617_v38, %v3016_v37  ;;  %v3021_v42 = vor.u32 %v3615_v39, %v3018_v41 }
  0xe0   :  { %v2877_v36 = vor.u32 %v3579_v34, %v2874_v35 }
  0xe2   :  { %1277 = vmatpush.bf16.msra.mxu0 %v2937_v44  ;;  %1269 = vmatpush.bf16.msrb.mxu3 %v2965_v52  ;;  %v3577_v44 = vld [vmem:[%s5639_s5 + $0x54] sm:$0xf0] }
  0xe3   :  { %1305 = vmatpush.bf16.msra.mxu2 %v2941_v48  ;;  %1241 = vmatpush.bf16.msrb.mxu1 %v2961_v49  ;;  %v2857_v46 = vor.u32 %v3577_v44, %v2856_v43  ;;  %v2861_v48 = vor.u32 %v3575_v45, %v2858_v47  ;;  %v3000_v49 = vld [vmem:[%s5639_s5 + $0x168] sm:$0xf] }
  0xe4   :  { %v3001_v52 = vor.u32 %v3613_v50, %v3000_v49  ;;  %v4818_v49 = vld [vmem:[%s5641_s6] sm:$0xf] }
  0xe6   :  { %1278 = vmatpush.bf16.msra.mxu0 %v2921_v57  ;;  %1270 = vmatpush.bf16.msrb.mxu3 %v2949_v5  ;;  %v3005_v57 = vor.u32 %v3611_v51, %v3002_v53  ;;  %v893_v51 = vperm.slane %v4818_v49, 0  ;;  %v895_v53 = vperm.slane %v4818_v49, 2 }
  0xe7   :  { %1306 = vmatpush.bf16.msra.mxu2 %v2925_v63  ;;  %1242 = vmatpush.bf16.msrb.mxu1 %v2945_v1  ;;  %v2984_v63 = vld [vmem:[%s5639_s5 + $0x148] sm:$0xf]  ;;  %v2845_v1 = vor.u32 %v3571_v61, %v2842_v62  ;;  %v3157_v61 = vor.u32 %v3652_v56, %v3156_v54  ;;  %v3676_v62 = vld [vmem:[%s5642_s7 + $0x170] sm:$0xf0] }
  0xe8   :  { %v2985_v5 = vor.u32 %v3609_v2, %v2984_v63  ;;  %v3348_v63 = vld [vmem:[%s5642_s7 + $0x228] sm:$0xf] }
  0xea   :  { %1319 = vmatpush.bf16.msra.mxu3 %v3069_v10  ;;  %1279 = vmatpush.bf16.msra.mxu0 %v2905_v15  ;;  %v2825_v10 = vor.u32 %v3569_v8, %v2824_v7 }
  0xeb   :  { %1291 = vmatpush.bf16.msra.mxu1 %v3065_v9  ;;  %1307 = vmatpush.bf16.msra.mxu2 %v2909_v17  ;;  %v3567_v9 = vld [vmem:[%s5639_s5 + $0xc] sm:$0xf] }
  0xec   :  { %v2829_v16 = vor.u32 %v3567_v9, %v2826_v11  ;;  %v3603_v17 = vld [vmem:[%s5639_s5 + $0x12c] sm:$0xf]  ;;  %v3240_v11 = vld [vmem:[%s5642_s7 + $0x150] sm:$0xf] }
  0xed   :  { %v2973_v20 = vor.u32 %v3603_v17, %v2970_v18 }
  0xee   :  { %1320 = vmatpush.bf16.msra.mxu3 %v3053_v23  ;;  %1280 = vmatpush.bf16.msra.mxu0 %v2889_v26  ;;  %v3601_v23 = vld [vmem:[%s5639_s5 + $0x114] sm:$0xf0] }
  0xef   :  { %1292 = vmatpush.bf16.msra.mxu1 %v3049_v21  ;;  %1308 = vmatpush.bf16.msra.mxu2 %v2893_v28  ;;  %v599_v21 = vld [vmem:[%s5640_s4] sm:$0x3]  ;;  %v2953_v26 = vor.u32 %v3601_v23, %v2952_v22  ;;  %v3132_v22 = vld [vmem:[%s5642_s7 + $0x78] sm:$0xf]  ;;  %v3646_v23 = vld [vmem:[%s5642_s7 + $0x80] sm:$0xf0] }
  0xf0   :  { %v601_v28 = vperm.slane %v599_v21, 0  ;;  %v602_v32 = vperm.slane %v599_v21, 1  ;;  %v3721_v21 = vld [vmem:[%s5642_s7 + $0x2d8] sm:$0xf0]  ;;  %v3133_v27 = vor.u32 %v3646_v23, %v3132_v22  ;;  %v3288_v22 = vld [vmem:[%s5642_s7 + $0x1b0] sm:$0xf] }
  0xf2   :  { %1321 = vmatpush.bf16.msra.mxu3 %v3037_v55  ;;  %1281 = vmatpush.bf16.msra.mxu0 %v2873_v60 }
  0xf3   :  { %1293 = vmatpush.bf16.msra.mxu1 %v3033_v31  ;;  %1309 = vmatpush.bf16.msra.mxu2 %v2877_v36 }
  0xf6   :  { %1322 = vmatpush.bf16.msra.mxu3 %v3021_v42  ;;  %1282 = vmatpush.bf16.msra.mxu0 %v2857_v46 }
  0xf7   :  { %1294 = vmatpush.bf16.msra.mxu1 %v3017_v40  ;;  %1310 = vmatpush.bf16.msra.mxu2 %v2861_v48 }
  0xfa   :  { %1323 = vmatpush.bf16.msra.mxu3 %v3005_v57  ;;  %1283 = vmatpush.bf16.msra.mxu0 %v2841_v58  ;;  %v3252_v57 = vld [vmem:[%s5642_s7 + $0x168] sm:$0xf] }
  0xfb   :  { %1295 = vmatpush.bf16.msra.mxu1 %v3001_v52  ;;  %1311 = vmatpush.bf16.msra.mxu2 %v2845_v1  ;;  %v894_v52 = vperm.slane %v4818_v49, 1  ;;  %v3700_v1 = vld [vmem:[%s5642_s7 + $0x230] sm:$0xf0]  ;;  %v3253_v2 = vor.u32 %v3676_v62, %v3252_v57 }
  0xfc   :  { %v3349_v3 = vor.u32 %v3700_v1, %v3348_v63  ;;  %v3664_v63 = vld [vmem:[%s5642_s7 + $0x110] sm:$0xf0]  ;;  %v3300_v1 = vld [vmem:[%s5642_s7 + $0x1c8] sm:$0xf] }
  0xfe   :  { %1324 = vmatpush.bf16.msra.mxu3 %v2989_v6  ;;  %1284 = vmatpush.bf16.msra.mxu0 %v2825_v10  ;;  %v3144_v6 = vld [vmem:[%s5642_s7 + $0x90] sm:$0xf]  ;;  %v3649_v10 = vld [vmem:[%s5642_s7 + $0x98] sm:$0xf0] }
  0xff   :  { %1296 = vmatpush.bf16.msra.mxu1 %v2985_v5  ;;  %1312 = vmatpush.bf16.msra.mxu2 %v2829_v16  ;;  %v3724_v5 = vld [vmem:[%s5642_s7 + $0x2f0] sm:$0xf0]  ;;  %v3432_v16 = vld [vmem:[%s5642_s7 + $0x2d0] sm:$0xf]  ;;  %v3145_v18 = vor.u32 %v3649_v10, %v3144_v6 }
 0x100   :  { %v3445_v9 = vor.u32 %v3724_v5, %v3444_v4  ;;  %v3433_v24 = vor.u32 %v3721_v21, %v3432_v16  ;;  %v3396_v4 = vld [vmem:[%s5642_s7 + $0x288] sm:$0xf]  ;;  %v3712_v5 = vld [vmem:[%s5642_s7 + $0x290] sm:$0xf0] }
 0x101   :  { %v3397_v21 = vor.u32 %v3712_v5, %v3396_v4  ;;  %v3655_v5 = vld [vmem:[%s5642_s7 + $0xc8] sm:$0xf0] }
 0x102   :  { %1325 = vmatpush.bf16.msra.mxu3 %v2973_v20 }
 0x103   :  { %1297 = vmatpush.bf16.msra.mxu1 %v2969_v19  ;;  %v3241_v19 = vor.u32 %v3673_v13, %v3240_v11 }
 0x106   :  { %1326 = vmatpush.bf16.msra.mxu3 %v2957_v29  ;;  %v3420_v29 = vld [vmem:[%s5642_s7 + $0x2b8] sm:$0xf] }
 0x107   :  { %1298 = vmatpush.bf16.msra.mxu1 %v2953_v26  ;;  %v3324_v26 = vld [vmem:[%s5642_s7 + $0x1f8] sm:$0xf] }
 0x136   :  { %v774_v15 = vpop.f32.mrf.mxu0 }
 0x137   :  { %v775_v59 = vadd.f32 %v774_v15, %v601_v28  ;;  %v3697_v15 = vld [vmem:[%s5642_s7 + $0x218] sm:$0xf0] }
 0x138   :  { %v3337_v20 = vor.u32 %v3697_v15, %v3336_v14  ;;  %v3096_v14 = vld [vmem:[%s5642_s7 + $0x30] sm:$0xf] }
 0x13c   :  { %v802_v25 = vpop.f32.mrf.mxu2 }
 0x13d   :  { %v803_v35 = vadd.f32 %v802_v25, %v602_v32  ;;  %v3228_v25 = vld [vmem:[%s5642_s7 + $0x138] sm:$0xf] }
 0x13e   :  { %v776_v30 = vpop.f32.mrf.mxu0 }
 0x13f   :  { %v777_v55 = vadd.f32 %v776_v30, %v601_v28  ;;  %v3694_v28 = vld [vmem:[%s5642_s7 + $0x200] sm:$0xf0] }
 0x140   :  { %v3718_v30 = vld [vmem:[%s5642_s7 + $0x2c0] sm:$0xf0] }
 0x144   :  { %v804_v60 = vpop.f32.mrf.mxu2 }
 0x145   :  { %v805_v38 = vadd.f32 %v804_v60, %v602_v32  ;;  %v3325_v32 = vor.u32 %v3694_v28, %v3324_v26  ;;  %v3685_v26 = vld [vmem:[%s5642_s7 + $0x1b8] sm:$0xf0] }
 0x156   :  { %v788_v12 = vpop.f32.mrf.mxu1 }
 0x157   :  { %v789_v0 = vadd.f32 %v788_v12, %v775_v59  ;;  %v3670_v12 = vld [vmem:[%s5642_s7 + $0x140] sm:$0xf0] }
 0x159   :  { %v821_v36 = vmax.f32 %v789_v0, 0.0  ;;  %v3643_v0 = vld [vmem:[%s5642_s7 + $0x68] sm:$0xf0] }
 0x15c   :  { %v816_v31 = vpop.f32.mrf.mxu3 }
 0x15d   :  { %v817_v39 = vadd.f32 %v816_v31, %v803_v35  ;;  %v3229_v31 = vor.u32 %v3670_v12, %v3228_v25  ;;  %v3421_v35 = vor.u32 %v3718_v30, %v3420_v29 }
 0x15e   :  { %v790_v33 = vpop.f32.mrf.mxu1 }
 0x15f   :  { %v791_v34 = vadd.f32 %v790_v33, %v777_v55  ;;  %v822_v43 = vmax.f32 %v817_v39, 0.0  ;;  %v3120_v55 = vld [vmem:[%s5642_s7 + $0x60] sm:$0xf] }
 0x160   :  { %v3216_v33 = vld [vmem:[%s5642_s7 + $0x120] sm:$0xf] }
 0x161   :  { %v823_v37 = vmax.f32 %v791_v34, 0.0 }
 0x163   :  { %v825_v40 = vpack.c.bf16 %v823_v37, %v821_v36  ;;  %v3667_v36 = vld [vmem:[%s5642_s7 + $0x128] sm:$0xf0]  ;;  %v3312_v37 = vld [vmem:[%s5642_s7 + $0x1e0] sm:$0xf] }
 0x164   :  { %v818_v41 = vpop.f32.mrf.mxu3  ;;  %v3217_v56 = vor.u32 %v3667_v36, %v3216_v33 }
 0x165   :  { %v819_v42 = vadd.f32 %v818_v41, %v805_v38  ;;  %1229 = vmatmul.bf16.vlgmr.msrb.gmra.mxu0 %v825_v40  ;;  %1257 = vmatmul.bf16.vlgmr.msrb.gmra.mxu2 %v825_v40  ;;  %v3691_v38 = vld [vmem:[%s5642_s7 + $0x1e8] sm:$0xf0]  ;;  %v3408_v41 = vld [vmem:[%s5642_s7 + $0x2a0] sm:$0xf] }
 0x166   :  { %2025 = vmatpush.bf16.msrb.mxu0 %v3157_v61  ;;  %2053 = vmatpush.bf16.msrb.mxu2 %v3349_v3  ;;  %v3313_v57 = vor.u32 %v3691_v38, %v3312_v37  ;;  %v3204_v61 = vld [vmem:[%s5642_s7 + $0x108] sm:$0xf]  ;;  %v3682_v38 = vld [vmem:[%s5642_s7 + $0x1a0] sm:$0xf0] }
 0x167   :  { %v824_v44 = vmax.f32 %v819_v42, 0.0  ;;  %v3715_v42 = vld [vmem:[%s5642_s7 + $0x2a8] sm:$0xf0]  ;;  %v3205_v16 = vor.u32 %v3664_v63, %v3204_v61 }
 0x168   :  { %v3409_v62 = vor.u32 %v3715_v42, %v3408_v41  ;;  %v3706_v41 = vld [vmem:[%s5642_s7 + $0x260] sm:$0xf0] }
 0x169   :  { %v826_v45 = vpack.c.bf16 %v824_v44, %v822_v43 }
 0x16a   :  { %2026 = vmatpush.bf16.msrb.mxu0 %v3145_v18  ;;  %2054 = vmatpush.bf16.msrb.mxu2 %v3337_v20  ;;  %v3661_v18 = vld [vmem:[%s5642_s7 + $0xf8] sm:$0xf0] }
 0x16b   :  { %1243 = vmatmul.bf16.vlgmr.msrb.gmra.mxu1 %v826_v45  ;;  %1271 = vmatmul.bf16.vlgmr.msrb.gmra.mxu3 %v826_v45 }
 0x16c   :  { %2039 = vmatpush.bf16.msrb.mxu1 %v3253_v2  ;;  %2067 = vmatpush.bf16.msrb.mxu3 %v3445_v9  ;;  %v3688_v2 = vld [vmem:[%s5642_s7 + $0x1d0] sm:$0xf0] }
 0x16e   :  { %2027 = vmatpush.bf16.msrb.mxu0 %v3133_v27  ;;  %2055 = vmatpush.bf16.msrb.mxu2 %v3325_v32  ;;  %v3084_v32 = vld [vmem:[%s5642_s7 + $0x18] sm:$0xf] }
 0x170   :  { %2040 = vmatpush.bf16.msrb.mxu1 %v3241_v19  ;;  %2068 = vmatpush.bf16.msrb.mxu3 %v3433_v24 }
 0x172   :  { %2056 = vmatpush.bf16.msrb.mxu2 %v3313_v57 }
 0x174   :  { %2041 = vmatpush.bf16.msrb.mxu1 %v3229_v31  ;;  %2069 = vmatpush.bf16.msrb.mxu3 %v3421_v35  ;;  %v3276_v35 = vld [vmem:[%s5642_s7 + $0x198] sm:$0xf] }
 0x175   :  { %1285 = vmatmul.bf16.vlgmr.msra.gmra.mxu0 %v825_v40  ;;  %1313 = vmatmul.bf16.vlgmr.msra.gmra.mxu2 %v825_v40 }
 0x178   :  { %2042 = vmatpush.bf16.msrb.mxu1 %v3217_v56  ;;  %2070 = vmatpush.bf16.msrb.mxu3 %v3409_v62 }
 0x17b   :  { %1299 = vmatmul.bf16.vlgmr.msra.gmra.mxu1 %v826_v45  ;;  %1327 = vmatmul.bf16.vlgmr.msra.gmra.mxu3 %v826_v45  ;;  %v896_v45 = vperm.slane %v4818_v49, 3 }
 0x17c   :  { %2043 = vmatpush.bf16.msrb.mxu1 %v3205_v16  ;;  %2071 = vmatpush.bf16.msrb.mxu3 %v3397_v21  ;;  %v3350_v21 = vld [vmem:[%s5642_s7 + $0x234] sm:$0xf0] }
 0x1e2   :  { %v1230_v46 = vpop.f32.mrf.mxu0 }
 0x1e3   :  { %v1231_v34 = vadd.f32 %v1230_v46, %v893_v51 }
 0x1e8   :  { %v4813_v47 = vpop.f32.mrf.mxu1  ;;  %v1258_v48 = vpop.f32.mrf.mxu2 }
 0x1e9   :  { %v1259_v59 = vadd.f32 %v1258_v48, %v894_v52  ;;  %v4934_v43 = vadd.f32 %v4813_v47, %v1231_v34  ;;  %v3121_v48 = vor.u32 %v3643_v0, %v3120_v55  ;;  %v3640_v47 = vld [vmem:[%s5642_s7 + $0x50] sm:$0xf0]  ;;  %v3289_v0 = vor.u32 %v3685_v26, %v3288_v22  ;;  %v3180_v34 = vld [vmem:[%s5642_s7 + $0xd8] sm:$0xf]  ;;  %v3723_v22 = vld [vmem:[%s5642_s7 + $0x2ec] sm:$0xf] }
 0x1ea   :  { %v4820_v50 = vpop.f32.mrf.mxu0  ;;  %v3648_v26 = vld [vmem:[%s5642_s7 + $0x94] sm:$0xf] }
 0x1eb   :  { %v1333_v6 = vmul.f32 %v4934_v43, %v4934_v43  ;;  %2028 = vmatpush.bf16.msrb.mxu0 %v3121_v48  ;;  %v1233_v19 = vadd.f32 %v4820_v50, %v893_v51  ;;  %v3384_v50 = vld [vmem:[%s5642_s7 + $0x270] sm:$0xf]  ;;  %v3709_v51 = vld [vmem:[%s5642_s7 + $0x278] sm:$0xf0] }
 0x1ec   :  { %v3385_v33 = vor.u32 %v3709_v51, %v3384_v50  ;;  %v3146_v50 = vld [vmem:[%s5642_s7 + $0x9c] sm:$0xf0] }
 0x1ee   :  { %v1272_v58 = vpop.f32.mrf.mxu3  ;;  %2072 = vmatpush.bf16.msrb.mxu3 %v3385_v33 }
 0x1ef   :  { %v4923_v39 = vadd.f32 %v1272_v58, %v1259_v59  ;;  %v3108_v58 = vld [vmem:[%s5642_s7 + $0x48] sm:$0xf] }
 0x1f0   :  { %v4852_v7 = vpop.f32.mrf.mxu1  ;;  %v4854_v8 = vpop.f32.mrf.mxu2  ;;  %v3109_v13 = vor.u32 %v3640_v47, %v3108_v58  ;;  %v3277_v58 = vor.u32 %v3682_v38, %v3276_v35  ;;  %v3669_v35 = vld [vmem:[%s5642_s7 + $0x13c] sm:$0xf] }
 0x1f1   :  { %v1334_v3 = vmul.f32 %v4923_v39, %v4923_v39  ;;  %v1261_v9 = vadd.f32 %v4854_v8, %v894_v52  ;;  %v3637_v52 = vld [vmem:[%s5642_s7 + $0x38] sm:$0xf0]  ;;  %v3192_v8 = vld [vmem:[%s5642_s7 + $0xf0] sm:$0xf]  ;;  %v5008_v27 = vadd.f32 %v4852_v7, %v1233_v19  ;;  %v3634_v7 = vld [vmem:[%s5642_s7 + $0x20] sm:$0xf0] }
 0x1f2   :  { %v1286_v17 = vpop.f32.mrf.mxu0  ;;  %2029 = vmatpush.bf16.msrb.mxu0 %v3109_v13  ;;  %v3193_v29 = vor.u32 %v3661_v18, %v3192_v8  ;;  %v3360_v13 = vld [vmem:[%s5642_s7 + $0x240] sm:$0xf]  ;;  %v3254_v8 = vld [vmem:[%s5642_s7 + $0x174] sm:$0xf0]  ;;  %v3693_v38 = vld [vmem:[%s5642_s7 + $0x1fc] sm:$0xf] }
 0x1f3   :  { %v1287_v40 = vadd.f32 %v1286_v17, %v895_v53  ;;  %v3301_v17 = vor.u32 %v3688_v2, %v3300_v1  ;;  %v1341_v12 = vadd.f32 %v1334_v3, %v1333_v6  ;;  %v1337_v42 = vmul.f32 %v5008_v27, %v5008_v27  ;;  %v3631_v2 = vld [vmem:[%s5642_s7 + $0x8] sm:$0xf0]  ;;  %v3168_v3 = vld [vmem:[%s5642_s7 + $0xc0] sm:$0xf] }
 0x1f4   :  { %2044 = vmatpush.bf16.msrb.mxu1 %v3193_v29  ;;  %v3264_v6 = vld [vmem:[%s5642_s7 + $0x180] sm:$0xf] }
 0x1f5   :  { %2057 = vmatpush.bf16.msrb.mxu2 %v3301_v17  ;;  %v3158_v17 = vld [vmem:[%s5642_s7 + $0xb4] sm:$0xf0]  ;;  %v3242_v29 = vld [vmem:[%s5642_s7 + $0x15c] sm:$0xf0] }
 0x1f6   :  { %v1274_v60 = vpop.f32.mrf.mxu3 }
 0x1f7   :  { %v4992_v23 = vadd.f32 %v1274_v60, %v1261_v9  ;;  %v3658_v60 = vld [vmem:[%s5642_s7 + $0xe0] sm:$0xf0]  ;;  %v3679_v9 = vld [vmem:[%s5642_s7 + $0x188] sm:$0xf0] }
 0x1f8   :  { %v1300_v44 = vpop.f32.mrf.mxu1  ;;  %v1314_v46 = vpop.f32.mrf.mxu2  ;;  %v3181_v56 = vor.u32 %v3658_v60, %v3180_v34  ;;  %v3645_v34 = vld [vmem:[%s5642_s7 + $0x7c] sm:$0xf]  ;;  %v3134_v60 = vld [vmem:[%s5642_s7 + $0x84] sm:$0xf0] }
 0x1f9   :  { %v4937_v54 = vadd.f32 %v1300_v44, %v1287_v40  ;;  %v1315_v10 = vadd.f32 %v1314_v46, %v896_v45  ;;  %v1338_v36 = vmul.f32 %v4992_v23, %v4992_v23  ;;  %v3372_v40 = vld [vmem:[%s5642_s7 + $0x258] sm:$0xf]  ;;  %v3085_v44 = vor.u32 %v3634_v7, %v3084_v32  ;;  %2058 = vmatpush.bf16.msrb.mxu2 %v3289_v0  ;;  %v3338_v32 = vld [vmem:[%s5642_s7 + $0x21c] sm:$0xf0]  ;;  %v3720_v7 = vld [vmem:[%s5642_s7 + $0x2d4] sm:$0xf] }
 0x1fa   :  { %v1288_v11 = vpop.f32.mrf.mxu0  ;;  %v3373_v47 = vor.u32 %v3706_v41, %v3372_v40  ;;  %2045 = vmatpush.bf16.msrb.mxu1 %v3181_v56  ;;  %v3326_v40 = vld [vmem:[%s5642_s7 + $0x204] sm:$0xf0]  ;;  %v3642_v56 = vld [vmem:[%s5642_s7 + $0x64] sm:$0xf] }
 0x1fb   :  { %v1335_v15 = vmul.f32 %v4937_v54, %v4937_v54  ;;  %v1289_v24 = vadd.f32 %v1288_v11, %v895_v53  ;;  %v3097_v53 = vor.u32 %v3637_v52, %v3096_v14  ;;  %v1346_v61 = vadd.f32 %v1338_v36, %v1337_v42  ;;  %v3703_v14 = vld [vmem:[%s5642_s7 + $0x248] sm:$0xf0] }
 0x1fc   :  { %2073 = vmatpush.bf16.msrb.mxu3 %v3373_v47  ;;  %v3265_v11 = vor.u32 %v3679_v9, %v3264_v6  ;;  %v3361_v16 = vor.u32 %v3703_v14, %v3360_v13  ;;  %v3675_v52 = vld [vmem:[%s5642_s7 + $0x16c] sm:$0xf]  ;;  %v3137_v36 = vor.u32 %v3645_v34, %v3134_v60  ;;  %v3329_v42 = vor.u32 %v3693_v38, %v3326_v40  ;;  %v3110_v6 = vld [vmem:[%s5642_s7 + $0x54] sm:$0xf0]  ;;  %v3705_v60 = vld [vmem:[%s5642_s7 + $0x25c] sm:$0xf] }
 0x1fd   :  { %v1342_v31 = vadd.f32 %v1341_v12, %v1335_v15  ;;  %2030 = vmatpush.bf16.msrb.mxu0 %v3097_v53  ;;  %2059 = vmatpush.bf16.msrb.mxu2 %v3277_v58  ;;  %v3651_v15 = vld [vmem:[%s5642_s7 + $0xac] sm:$0xf]  ;;  %v3257_v19 = vor.u32 %v3675_v52, %v3254_v8  ;;  %v3446_v12 = vld [vmem:[%s5642_s7 + $0x2f4] sm:$0xf0]  ;;  %v3672_v53 = vld [vmem:[%s5642_s7 + $0x154] sm:$0xf] }
 0x1fe   :  { %v1328_v20 = vpop.f32.mrf.mxu3  ;;  %v3161_v18 = vor.u32 %v3651_v15, %v3158_v17  ;;  %v3449_v51 = vor.u32 %v3723_v22, %v3446_v12  ;;  %v3666_v58 = vld [vmem:[%s5642_s7 + $0x124] sm:$0xf]  ;;  %v3663_v9 = vld [vmem:[%s5642_s7 + $0x10c] sm:$0xf]  ;;  %v3302_v14 = vld [vmem:[%s5642_s7 + $0x1d4] sm:$0xf0] }
 0x1ff   :  { %v4996_v25 = vadd.f32 %v1328_v20, %v1315_v10  ;;  %v3169_v10 = vor.u32 %v3655_v5, %v3168_v3  ;;  %v3699_v20 = vld [vmem:[%s5642_s7 + $0x22c] sm:$0xf]  ;;  %v3410_v3 = vld [vmem:[%s5642_s7 + $0x2ac] sm:$0xf0]  ;;  %v3398_v52 = vld [vmem:[%s5642_s7 + $0x294] sm:$0xf0] }
 0x200   :  { %v1302_v28 = vpop.f32.mrf.mxu1  ;;  %v1316_v55 = vpop.f32.mrf.mxu2  ;;  %2074 = vmatpush.bf16.msrb.mxu3 %v3361_v16  ;;  %v3639_v5 = vld [vmem:[%s5642_s7 + $0x4c] sm:$0xf]  ;;  %v3194_v22 = vld [vmem:[%s5642_s7 + $0xfc] sm:$0xf0]  ;;  %v3074_v38 = vld [vmem:[%s5642_s7 + $0xc] sm:$0xf0] }
 0x201   :  { %v5010_v30 = vadd.f32 %v1302_v28, %v1289_v24  ;;  %v1336_v59 = vmul.f32 %v4996_v25, %v4996_v25  ;;  %v1317_v48 = vadd.f32 %v1316_v55, %v896_v45  ;;  %2031 = vmatpush.bf16.msrb.mxu0 %v3085_v44  ;;  %v3072_v45 = vld [vmem:[%s5642_s7] sm:$0xf]  ;;  %2046 = vmatpush.bf16.msrb.mxu1 %v3169_v10  ;;  %v3717_v44 = vld [vmem:[%s5642_s7 + $0x2bc] sm:$0xf]  ;;  %v3687_v13 = vld [vmem:[%s5642_s7 + $0x1cc] sm:$0xf] }
 0x202   :  { %v3073_v4 = vor.u32 %v3631_v2, %v3072_v45  ;;  %2060 = vmatpush.bf16.msrb.mxu2 %v3265_v11  ;;  %v3353_v24 = vor.u32 %v3699_v20, %v3350_v21  ;;  %v3149_v28 = vor.u32 %v3648_v26, %v3146_v50  ;;  %v3434_v55 = vld [vmem:[%s5642_s7 + $0x2dc] sm:$0xf0]  ;;  %v3714_v2 = vld [vmem:[%s5642_s7 + $0x2a4] sm:$0xf]  ;;  %v3113_v10 = vor.u32 %v3639_v5, %v3110_v6  ;;  %v3206_v11 = vld [vmem:[%s5642_s7 + $0x114] sm:$0xf0] }
 0x203   :  { %v1343_v37 = vadd.f32 %v1342_v31, %v1336_v59  ;;  %v1339_v46 = vmul.f32 %v5010_v30, %v5010_v30  ;;  %v3696_v59 = vld [vmem:[%s5642_s7 + $0x214] sm:$0xf]  ;;  %v3245_v31 = vor.u32 %v3672_v53, %v3242_v29  ;;  %v3437_v33 = vor.u32 %v3720_v7, %v3434_v55  ;;  %v3711_v17 = vld [vmem:[%s5642_s7 + $0x28c] sm:$0xf]  ;;  %v3290_v12 = vld [vmem:[%s5642_s7 + $0x1bc] sm:$0xf0] }
 0x204   :  { %2123 = vmatpush.bf16.msra.mxu3 %v3449_v51  ;;  %v3341_v0 = vor.u32 %v3696_v59, %v3338_v32  ;;  %v3209_v15 = vor.u32 %v3663_v9, %v3206_v11  ;;  %v3305_v16 = vor.u32 %v3687_v13, %v3302_v14  ;;  %v3401_v8 = vor.u32 %v3711_v17, %v3398_v52  ;;  %v3660_v20 = vld [vmem:[%s5642_s7 + $0xf4] sm:$0xf]  ;;  %v3633_v29 = vld [vmem:[%s5642_s7 + $0x1c] sm:$0xf]  ;;  %v3086_v59 = vld [vmem:[%s5642_s7 + $0x24] sm:$0xf0] }
 0x205   :  { %1344 = vadd.xlane.f32.xlu0 %v1343_v37  ;;  %v1347_v1 = vadd.f32 %v1346_v61, %v1339_v46  ;;  %2032 = vmatpush.bf16.msrb.mxu0 %v3073_v4  ;;  %v3230_v37 = vld [vmem:[%s5642_s7 + $0x144] sm:$0xf0]  ;;  %v3218_v61 = vld [vmem:[%s5642_s7 + $0x12c] sm:$0xf0]  ;;  %v3413_v4 = vor.u32 %v3714_v2, %v3410_v3  ;;  %v3197_v26 = vor.u32 %v3660_v20, %v3194_v22  ;;  %v3708_v51 = vld [vmem:[%s5642_s7 + $0x274] sm:$0xf] }
 0x206   :  { %v1330_v57 = vpop.f32.mrf.mxu3  ;;  %2095 = vmatpush.bf16.msra.mxu1 %v3257_v19  ;;  %2109 = vmatpush.bf16.msra.mxu2 %v3353_v24  ;;  %v3233_v41 = vor.u32 %v3669_v35, %v3230_v37  ;;  %v3422_v46 = vld [vmem:[%s5642_s7 + $0x2c4] sm:$0xf0]  ;;  %v3098_v19 = vld [vmem:[%s5642_s7 + $0x3c] sm:$0xf0]  ;;  %v3684_v24 = vld [vmem:[%s5642_s7 + $0x1b4] sm:$0xf]  ;;  %v3089_v32 = vor.u32 %v3633_v29, %v3086_v59 }
 0x207   :  { %v5046_v62 = vadd.f32 %v1330_v57, %v1317_v48  ;;  %v3425_v48 = vor.u32 %v3717_v44, %v3422_v46  ;;  %v3122_v57 = vld [vmem:[%s5642_s7 + $0x6c] sm:$0xf0]  ;;  %v3293_v50 = vor.u32 %v3684_v24, %v3290_v12  ;;  %v3182_v7 = vld [vmem:[%s5642_s7 + $0xe4] sm:$0xf0]  ;;  %v3681_v55 = vld [vmem:[%s5642_s7 + $0x19c] sm:$0xf] }
 0x208   :  { %2124 = vmatpush.bf16.msra.mxu3 %v3437_v33  ;;  %v3125_v47 = vor.u32 %v3642_v56, %v3122_v57  ;;  %v3374_v35 = vld [vmem:[%s5642_s7 + $0x264] sm:$0xf0]  ;;  %v3630_v37 = vld [vmem:[%s5642_s7 + $0x4] sm:$0xf]  ;;  %v3170_v44 = vld [vmem:[%s5642_s7 + $0xcc] sm:$0xf0] }
 0x209   :  { %v1340_v63 = vmul.f32 %v5046_v62, %v5046_v62  ;;  %2081 = vmatpush.bf16.msra.mxu0 %v3161_v18  ;;  %v3636_v18 = vld [vmem:[%s5642_s7 + $0x34] sm:$0xf]  ;;  %v3654_v40 = vld [vmem:[%s5642_s7 + $0xc4] sm:$0xf]  ;;  %v3746_v14 = vmov 0  }
 0x20a   :  { %2096 = vmatpush.bf16.msra.mxu1 %v3245_v31  ;;  %2110 = vmatpush.bf16.msra.mxu2 %v3341_v0  ;;  %v3101_v21 = vor.u32 %v3636_v18, %v3098_v19  ;;  %v3657_v31 = vld [vmem:[%s5642_s7 + $0xdc] sm:$0xf]  ;;  %v3278_v0 = vld [vmem:[%s5642_s7 + $0x1a4] sm:$0xf0]  ;;  %v3678_v46 = vld [vmem:[%s5642_s7 + $0x184] sm:$0xf]  ;;  %v3173_v57 = vor.u32 %v3654_v40, %v3170_v44 }
 0x20b   :  { %v1348_v49 = vadd.f32 %v1347_v1, %v1340_v63  ;;  %v3690_v63 = vld [vmem:[%s5642_s7 + $0x1e4] sm:$0xf]  ;;  %v3314_v1 = vld [vmem:[%s5642_s7 + $0x1ec] sm:$0xf0]  ;;  %v3185_v33 = vor.u32 %v3657_v31, %v3182_v7  ;;  %v3281_v34 = vor.u32 %v3681_v55, %v3278_v0  ;;  %3728 = vset.pattern.permute.xlu1 %v3746_v14  ;;  %3729 = vset.pattern.permute.xlu0 %v3746_v14  ;;  %v3653_v18 = vld [vmem:[%s5642_s7 + $0xb8] sm:$0xf0] }
 0x20c   :  { %v3317_v45 = vor.u32 %v3690_v63, %v3314_v1  ;;  %2125 = vmatpush.bf16.msra.mxu3 %v3425_v48  ;;  %v3266_v48 = vld [vmem:[%s5642_s7 + $0x18c] sm:$0xf0]  ;;  %v2348_v13 = vld [vmem:[%s5643_s9] sm:$0xff]  ;;  %v3725_v29 = vld [vmem:[%s5642_s7 + $0x2f8] sm:$0xf0] }
 0x20d   :  { %1349 = vadd.xlane.f32.xlu0 %v1348_v49  ;;  %2082 = vmatpush.bf16.msra.mxu0 %v3149_v28  ;;  %v3221_v49 = vor.u32 %v3666_v58, %v3218_v61  ;;  %v3386_v28 = vld [vmem:[%s5642_s7 + $0x27c] sm:$0xf0]  ;;  %v3269_v58 = vor.u32 %v3678_v46, %v3266_v48  ;;  %v3362_v61 = vld [vmem:[%s5642_s7 + $0x24c] sm:$0xf0]  ;;  %v3650_v7 = vld [vmem:[%s5642_s7 + $0xa0] sm:$0xf0] }
 0x20e   :  { %2097 = vmatpush.bf16.msra.mxu1 %v3233_v41  ;;  %2111 = vmatpush.bf16.msra.mxu2 %v3329_v42  ;;  %v3389_v53 = vor.u32 %v3708_v51, %v3386_v28  ;;  %v3077_v42 = vor.u32 %v3630_v37, %v3074_v38  ;;  %v3260_v20 = vld [vmem:[%s5642_s7 + $0x170] sm:$0xf]  ;;  %v3722_v37 = vld [vmem:[%s5642_s7 + $0x2e0] sm:$0xf0]  ;;  %v3236_v48 = vld [vmem:[%s5642_s7 + $0x140] sm:$0xf] }
 0x20f   :  { %2351 = vperm.xlu1 %3728, %v2348_v13  }
 0x210   :  { %2126 = vmatpush.bf16.msra.mxu3 %v3413_v4 }
 0x211   :  { %2083 = vmatpush.bf16.msra.mxu0 %v3137_v36  ;;  %v3377_v36 = vor.u32 %v3705_v60, %v3374_v35  ;;  %v3344_v60 = vld [vmem:[%s5642_s7 + $0x218] sm:$0xf]  ;;  %v3698_v35 = vld [vmem:[%s5642_s7 + $0x220] sm:$0xf0] }
 0x212   :  { %2098 = vmatpush.bf16.msra.mxu1 %v3221_v49  ;;  %2112 = vmatpush.bf16.msra.mxu2 %v3317_v45  ;;  %v3345_v44 = vor.u32 %v3698_v35, %v3344_v60  ;;  %v3284_v60 = vld [vmem:[%s5642_s7 + $0x1a0] sm:$0xf]  ;;  %v3683_v35 = vld [vmem:[%s5642_s7 + $0x1a8] sm:$0xf0] }
 0x214   :  { %2127 = vmatpush.bf16.msra.mxu3 %v3401_v8  ;;  %v3164_v8 = vld [vmem:[%s5642_s7 + $0xb0] sm:$0xf] }
 0x215   :  { %2084 = vmatpush.bf16.msra.mxu0 %v3125_v47  ;;  %v3702_v47 = vld [vmem:[%s5642_s7 + $0x244] sm:$0xf]  ;;  %v3165_v59 = vor.u32 %v3653_v18, %v3164_v8  ;;  %v3212_v8 = vld [vmem:[%s5642_s7 + $0x110] sm:$0xf]  ;;  %v3665_v18 = vld [vmem:[%s5642_s7 + $0x118] sm:$0xf0] }
 0x216   :  { %2099 = vmatpush.bf16.msra.mxu1 %v3209_v15  ;;  %2113 = vmatpush.bf16.msra.mxu2 %v3305_v16  ;;  %v3365_v63 = vor.u32 %v3702_v47, %v3362_v61  ;;  %v3428_v47 = vld [vmem:[%s5642_s7 + $0x2c0] sm:$0xf]  ;;  %v3719_v61 = vld [vmem:[%s5642_s7 + $0x2c8] sm:$0xf0] }
 0x218   :  { %2128 = vmatpush.bf16.msra.mxu3 %v3389_v53 }
 0x219   :  { %2085 = vmatpush.bf16.msra.mxu0 %v3113_v10 }
 0x21a   :  { %2100 = vmatpush.bf16.msra.mxu1 %v3197_v26  ;;  %2114 = vmatpush.bf16.msra.mxu2 %v3293_v50  ;;  %v3356_v50 = vld [vmem:[%s5642_s7 + $0x230] sm:$0xf] }
 0x21c   :  { %2129 = vmatpush.bf16.msra.mxu3 %v3377_v36  ;;  %v3440_v36 = vld [vmem:[%s5642_s7 + $0x2d8] sm:$0xf] }
 0x21d   :  { %2086 = vmatpush.bf16.msra.mxu0 %v3101_v21  ;;  %v3677_v21 = vld [vmem:[%s5642_s7 + $0x178] sm:$0xf0]  ;;  %v3441_v46 = vor.u32 %v3722_v37, %v3440_v36  ;;  %v3380_v36 = vld [vmem:[%s5642_s7 + $0x260] sm:$0xf]  ;;  %v3707_v37 = vld [vmem:[%s5642_s7 + $0x268] sm:$0xf0] }
 0x21e   :  { %2101 = vmatpush.bf16.msra.mxu1 %v3185_v33  ;;  %2115 = vmatpush.bf16.msra.mxu2 %v3281_v34  ;;  %v3248_v33 = vld [vmem:[%s5642_s7 + $0x158] sm:$0xf]  ;;  %v3674_v34 = vld [vmem:[%s5642_s7 + $0x160] sm:$0xf0] }
 0x21f   :  { %v3249_v40 = vor.u32 %v3674_v34, %v3248_v33  ;;  %v3188_v33 = vld [vmem:[%s5642_s7 + $0xe0] sm:$0xf]  ;;  %v3659_v34 = vld [vmem:[%s5642_s7 + $0xe8] sm:$0xf0] }
 0x220   :  { %2130 = vmatpush.bf16.msra.mxu3 %v3365_v63 }
 0x221   :  { %2087 = vmatpush.bf16.msra.mxu0 %v3089_v32  ;;  %v3152_v32 = vld [vmem:[%s5642_s7 + $0x98] sm:$0xf] }
 0x222   :  { %2102 = vmatpush.bf16.msra.mxu1 %v3173_v57  ;;  %2116 = vmatpush.bf16.msra.mxu2 %v3269_v58  ;;  %v3153_v38 = vor.u32 %v3650_v7, %v3152_v32  ;;  %v3332_v57 = vld [vmem:[%s5642_s7 + $0x200] sm:$0xf]  ;;  %v3695_v58 = vld [vmem:[%s5642_s7 + $0x208] sm:$0xf0] }
 0x223   :  { %v3092_v32 = vld [vmem:[%s5642_s7 + $0x20] sm:$0xf]  ;;  %v3635_v7 = vld [vmem:[%s5642_s7 + $0x28] sm:$0xf0] }
 0x225   :  { %2088 = vmatpush.bf16.msra.mxu0 %v3077_v42  ;;  %v3647_v42 = vld [vmem:[%s5642_s7 + $0x88] sm:$0xf0] }
 0x278   :  { %v1345_v41 = vpop.xlane.xlu0 %1344 }
 0x279   :  { %v1351_v56 = vmax.f32 %v1345_v41, 1e-24  ;;  %v3140_v41 = vld [vmem:[%s5642_s7 + $0x80] sm:$0xf] }
 0x27a   :  { %v3141_v63 = vor.u32 %v3647_v42, %v3140_v41  ;;  %v3080_v41 = vld [vmem:[%s5642_s7 + $0x8] sm:$0xf]  ;;  %v3632_v42 = vld [vmem:[%s5642_s7 + $0x10] sm:$0xf0] }
 0x27b   :  { %3730 = vrsqrt.f32 %v1351_v56  ;;  %vm1359_vm1 = vweird.f32 %v1351_v56 }
 0x280   :  { %v1350_v1 = vpop.xlane.xlu0 %1349 }
 0x281   :  { %v3731_v49 = vpop.eup %3730  ;;  %v1352_v45 = vmax.f32 %v1350_v1, 1e-24 }
 0x282   :  { %v1354_v2 = vmul.f32 %v3731_v49, %v1351_v56  ;;  %vm1360_vm0 = vweird.f32 %v3731_v49  ;;  %v3671_v56 = vld [vmem:[%s5642_s7 + $0x148] sm:$0xf0] }
 0x283   :  { %3732 = vrsqrt.f32 %v1352_v45  ;;  %vm1361_vm2 = vmor %vm1359_vm1, %vm1360_vm0  ;;  %vm1369_vm4 = vweird.f32 %v1352_v45  ;;  %v3237_v1 = vor.u32 %v3671_v56, %v3236_v48  ;;  %v3176_v48 = vld [vmem:[%s5642_s7 + $0xc8] sm:$0xf]  ;;  %v3656_v56 = vld [vmem:[%s5642_s7 + $0xd0] sm:$0xf0] }
 0x284   :  { %v1355_v3 = vmul.f32 %v3731_v49, %v1354_v2  ;;  %v3333_v2 = vor.u32 %v3695_v58, %v3332_v57  ;;  %v3272_v57 = vld [vmem:[%s5642_s7 + $0x188] sm:$0xf]  ;;  %v3680_v58 = vld [vmem:[%s5642_s7 + $0x190] sm:$0xf0] }
 0x286   :  { %v1356_v4 = vmul.f32 0.5, %v1355_v3  ;;  %v3429_v3 = vor.u32 %v3719_v61, %v3428_v47  ;;  %v3368_v47 = vld [vmem:[%s5642_s7 + $0x248] sm:$0xf]  ;;  %v3704_v61 = vld [vmem:[%s5642_s7 + $0x250] sm:$0xf0] }
 0x288   :  { %v1357_v5 = vsub.f32 1.5, %v1356_v4  ;;  %v3224_v4 = vld [vmem:[%s5642_s7 + $0x128] sm:$0xf] }
 0x289   :  { %v3733_v6 = vpop.eup %3732 }
 0x28a   :  { %v1364_v9 = vmul.f32 %v3733_v6, %v1352_v45  ;;  %v1358_v10 = vmul.f32 %v3731_v49, %v1357_v5  ;;  %vm1370_vm3 = vweird.f32 %v3733_v6  ;;  %v3644_v45 = vld [vmem:[%s5642_s7 + $0x70] sm:$0xf0] }
 0x28b   :  { %vm1371_vm5 = vmor %vm1369_vm4, %vm1370_vm3  ;;  %v3668_v5 = vld [vmem:[%s5642_s7 + $0x130] sm:$0xf0] }
 0x28c   :  { %v1365_v11 = vmul.f32 %v3733_v6, %v1364_v9  ;;  %v1362_v16 = vsel %vm1361_vm2, %v3731_v49, %v1358_v10  ;;  %v3128_v49 = vld [vmem:[%s5642_s7 + $0x68] sm:$0xf]  ;;  %v3692_v9 = vld [vmem:[%s5642_s7 + $0x1f0] sm:$0xf0]  ;;  %v3225_v14 = vor.u32 %v3668_v5, %v3224_v4  ;;  %v5495_v4 = vld [vmem:[%s5644_s8] sm:$0x7] }
 0x28d   :  { %v1373_v19 = vmul.f32 %v1362_v16, %v4934_v43  ;;  %v1374_v24 = vmul.f32 %v1362_v16, %v4923_v39  ;;  %v1375_v12 = vmul.f32 %v1362_v16, %v4937_v54  ;;  %v1376_v26 = vmul.f32 %v1362_v16, %v4996_v25  ;;  %v2349_v43 = vld [vmem:[%s5643_s9 + $0x8] sm:$0xff]  ;;  %v3701_v54 = vld [vmem:[%s5642_s7 + $0x238] sm:$0xf0]  ;;  %v3452_v25 = vld [vmem:[%s5642_s7 + $0x2f0] sm:$0xf] }
 0x28e   :  { %v1366_v15 = vmul.f32 0.5, %v1365_v11  ;;  %2354 = vperm.xlu1 %3728, %v2349_v43   ;;  %v3357_v55 = vor.u32 %v3701_v54, %v3356_v50  ;;  %v3453_v0 = vor.u32 %v3725_v29, %v3452_v25  ;;  %v3416_v10 = vld [vmem:[%s5642_s7 + $0x2a8] sm:$0xf]  ;;  %v3716_v11 = vld [vmem:[%s5642_s7 + $0x2b0] sm:$0xf0]  ;;  %v3129_v13 = vor.u32 %v3644_v45, %v3128_v49 }
 0x28f   :  { %v3641_v16 = vld [vmem:[%s5642_s7 + $0x58] sm:$0xf0]  ;;  %v3638_v50 = vld [vmem:[%s5642_s7 + $0x40] sm:$0xf0]  ;;  %v3392_v25 = vld [vmem:[%s5642_s7 + $0x278] sm:$0xf]  ;;  %v3273_v49 = vor.u32 %v3680_v58, %v3272_v57  ;;  %v3369_v45 = vor.u32 %v3704_v61, %v3368_v47 }
 0x290   :  { %v1367_v17 = vsub.f32 1.5, %v1366_v15  ;;  %v3116_v15 = vld [vmem:[%s5642_s7 + $0x50] sm:$0xf]  ;;  %v3686_v54 = vld [vmem:[%s5642_s7 + $0x1c0] sm:$0xf0] }
 0x291   :  { %v3710_v29 = vld [vmem:[%s5642_s7 + $0x280] sm:$0xf0] }
 0x292   :  { %v1368_v52 = vmul.f32 %v3733_v6, %v1367_v17 }
 0x294   :  { %v1372_v22 = vsel %vm1371_vm5, %v3733_v6, %v1368_v52  ;;  %v3320_v6 = vld [vmem:[%s5642_s7 + $0x1e8] sm:$0xf]  ;;  %v3417_v52 = vor.u32 %v3716_v11, %v3416_v10  ;;  %v2195_v11 = vperm.slane %v5495_v4, 0 }
 0x295   :  { %v1377_v51 = vmul.f32 %v1372_v22, %v5008_v27  ;;  %v1378_v28 = vmul.f32 %v1372_v22, %v4992_v23  ;;  %v1379_v53 = vmul.f32 %v1372_v22, %v5010_v30  ;;  %v1380_v39 = vmul.f32 %v1372_v22, %v5046_v62  ;;  %v3713_v22 = vld [vmem:[%s5642_s7 + $0x298] sm:$0xf0] }
 0x296   :  { %v3261_v27 = vor.u32 %v3677_v21, %v3260_v20  ;;  %v3321_v17 = vor.u32 %v3692_v9, %v3320_v6  ;;  %v3689_v20 = vld [vmem:[%s5642_s7 + $0x1d8] sm:$0xf0]  ;;  %v3404_v21 = vld [vmem:[%s5642_s7 + $0x290] sm:$0xf] }
 0x297   :  { %v5304_v23 = vpack.c.bf16 %v1377_v51, %v1373_v19  ;;  %v5306_v30 = vpack.c.bf16 %v1378_v28, %v1374_v24  ;;  %v5308_v62 = vpack.c.bf16 %v1379_v53, %v1375_v12  ;;  %v5310_v31 = vpack.c.bf16 %v1380_v39, %v1376_v26  ;;  %v3308_v19 = vld [vmem:[%s5642_s7 + $0x1d0] sm:$0xf]  ;;  %v3104_v26 = vld [vmem:[%s5642_s7 + $0x38] sm:$0xf]  ;;  %v3662_v53 = vld [vmem:[%s5642_s7 + $0x100] sm:$0xf0] }
 0x298   :  { %v3117_v24 = vor.u32 %v3641_v16, %v3116_v15  ;;  %v3213_v12 = vor.u32 %v3665_v18, %v3212_v8  ;;  %v3309_v43 = vor.u32 %v3689_v20, %v3308_v19  ;;  %v3405_v51 = vor.u32 %v3713_v22, %v3404_v21  ;;  %v3200_v28 = vld [vmem:[%s5642_s7 + $0xf8] sm:$0xf] }
 0x299   :  { %2033 = vmatmul.bf16.vlgmr.msrb.gmra.mxu0 %v5304_v23  ;;  %2047 = vmatmul.bf16.vlgmr.msrb.gmra.mxu1 %v5306_v30  ;;  %v3296_v39 = vld [vmem:[%s5642_s7 + $0x1b8] sm:$0xf] }
 0x29a   :  { %2061 = vmatmul.bf16.vlgmr.msrb.gmra.mxu2 %v5308_v62  ;;  %2075 = vmatmul.bf16.vlgmr.msrb.gmra.mxu3 %v5310_v31 }
 0x29b   :  { %2137 = vmatpush.bf16.msrb.mxu0 %v3165_v59  ;;  %2151 = vmatpush.bf16.msrb.mxu1 %v3261_v27  ;;  %v3105_v59 = vor.u32 %v3638_v50, %v3104_v26  ;;  %v3201_v27 = vor.u32 %v3662_v53, %v3200_v28  ;;  %v5507_v28 = vpop.permute.xlu1 %2351 }
 0x29c   :  { %2165 = vmatpush.bf16.msrb.mxu2 %v3357_v55  ;;  %2179 = vmatpush.bf16.msrb.mxu3 %v3453_v0  ;;  %v3297_v55 = vor.u32 %v3686_v54, %v3296_v39  ;;  %v3393_v0 = vor.u32 %v3710_v29, %v3392_v25  ;;  %v2340_v29 = vlaneseq }
 0x29f   :  { %2138 = vmatpush.bf16.msrb.mxu0 %v3153_v38  ;;  %2152 = vmatpush.bf16.msrb.mxu1 %v3249_v40  ;;  %v3093_v38 = vor.u32 %v3635_v7, %v3092_v32  ;;  %v3189_v40 = vor.u32 %v3659_v34, %v3188_v33  ;;  %v5515_v34 = vand.u32 127, %v2340_v29 }
 0x2a0   :  { %2166 = vmatpush.bf16.msrb.mxu2 %v3345_v44  ;;  %2180 = vmatpush.bf16.msrb.mxu3 %v3441_v46  ;;  %v3285_v44 = vor.u32 %v3683_v35, %v3284_v60  ;;  %v3381_v46 = vor.u32 %v3707_v37, %v3380_v36 }
 0x2a1   :  { %vm2356_vm6 = vcmp.eq.s32.totalorder %v5515_v34, %v5507_v28 }
 0x2a3   :  { %2139 = vmatpush.bf16.msrb.mxu0 %v3141_v63  ;;  %2153 = vmatpush.bf16.msrb.mxu1 %v3237_v1  ;;  %v3081_v63 = vor.u32 %v3632_v42, %v3080_v41  ;;  %v3177_v1 = vor.u32 %v3656_v56, %v3176_v48 }
 0x2a4   :  { %2167 = vmatpush.bf16.msrb.mxu2 %v3333_v2  ;;  %2181 = vmatpush.bf16.msrb.mxu3 %v3429_v3 }
 0x2a7   :  { %2140 = vmatpush.bf16.msrb.mxu0 %v3129_v13  ;;  %2154 = vmatpush.bf16.msrb.mxu1 %v3225_v14 }
 0x2a8   :  { %2168 = vmatpush.bf16.msrb.mxu2 %v3321_v17  ;;  %2182 = vmatpush.bf16.msrb.mxu3 %v3417_v52 }
 0x2a9   :  { %2089 = vmatmul.bf16.vlgmr.msra.gmra.mxu0 %v5304_v23  ;;  %2103 = vmatmul.bf16.vlgmr.msra.gmra.mxu1 %v5306_v30 }
 0x2aa   :  { %2117 = vmatmul.bf16.vlgmr.msra.gmra.mxu2 %v5308_v62  ;;  %2131 = vmatmul.bf16.vlgmr.msra.gmra.mxu3 %v5310_v31 }
 0x2ab   :  { %2141 = vmatpush.bf16.msrb.mxu0 %v3117_v24  ;;  %2155 = vmatpush.bf16.msrb.mxu1 %v3213_v12 }
 0x2ac   :  { %2169 = vmatpush.bf16.msrb.mxu2 %v3309_v43  ;;  %2183 = vmatpush.bf16.msrb.mxu3 %v3405_v51  ;;  %v2196_v51 = vperm.slane %v5495_v4, 1 }
 0x2af   :  { %2142 = vmatpush.bf16.msrb.mxu0 %v3105_v59  ;;  %2156 = vmatpush.bf16.msrb.mxu1 %v3201_v27 }
 0x2b0   :  { %2170 = vmatpush.bf16.msrb.mxu2 %v3297_v55  ;;  %2184 = vmatpush.bf16.msrb.mxu3 %v3393_v0 }
 0x2b3   :  { %2143 = vmatpush.bf16.msrb.mxu0 %v3093_v38  ;;  %2157 = vmatpush.bf16.msrb.mxu1 %v3189_v40 }
 0x2b4   :  { %2171 = vmatpush.bf16.msrb.mxu2 %v3285_v44  ;;  %2185 = vmatpush.bf16.msrb.mxu3 %v3381_v46 }
 0x2b7   :  { %2144 = vmatpush.bf16.msrb.mxu0 %v3081_v63  ;;  %2158 = vmatpush.bf16.msrb.mxu1 %v3177_v1  ;;  %v3747_v63 = vmov 0.0  }
 0x2b8   :  { %2172 = vmatpush.bf16.msrb.mxu2 %v3273_v49  ;;  %2186 = vmatpush.bf16.msrb.mxu3 %v3369_v45  ;;  %v3460_v1 = vsel %vm2356_vm6, 1.0, %v3747_v63 }
 0x2ba   :  { %2145 = vmatmul.bf16.vlgmr.msrb.gmra.mxu0 %v5304_v23  ;;  %2159 = vmatmul.bf16.vlgmr.msrb.gmra.mxu1 %v5306_v30 }
 0x2bb   :  { %2173 = vmatmul.bf16.vlgmr.msrb.gmra.mxu2 %v5308_v62  ;;  %2187 = vmatmul.bf16.vlgmr.msrb.gmra.mxu3 %v5310_v31 }
 0x300   :  { %v5520_v46 = vpop.permute.xlu1 %2354 }
 0x301   :  { %vm2359_vm7 = vcmp.eq.s32.totalorder %v5515_v34, %v5520_v46 }
 0x316   :  { %v2034_v2 = vpop.f32.mrf.mxu0  ;;  %v2048_v3 = vpop.f32.mrf.mxu1 }
 0x317   :  { %v2049_v5 = vadd.f32 %v2048_v3, %v2034_v2 }
 0x31d   :  { %v2062_v6 = vpop.f32.mrf.mxu2  ;;  %v2076_v9 = vpop.f32.mrf.mxu3 }
 0x31e   :  { %v2063_v10 = vadd.f32 %v2062_v6, %v2049_v5  ;;  %v2036_v23 = vpop.f32.mrf.mxu0  ;;  %v2050_v13 = vpop.f32.mrf.mxu1 }
 0x31f   :  { %v2051_v31 = vadd.f32 %v2050_v13, %v2036_v23 }
 0x320   :  { %v2077_v30 = vadd.f32 %v2076_v9, %v2063_v10  ;;  %v2197_v10 = vperm.slane %v5495_v4, 2 }
 0x322   :  { %v5498_v14 = vmul.f32 %v2195_v11, %v2077_v30 }
 0x324   :  { %v2207_v62 = vmul.f32 %v5498_v14, %v5498_v14  ;;  %vm2321_vm10 = vcmp.gt.f32.partialorder %v5498_v14, -0.87758255 }
 0x325   :  { %v2064_v15 = vpop.f32.mrf.mxu2  ;;  %v2078_v16 = vpop.f32.mrf.mxu3 }
 0x326   :  { %v2213_v17 = vsub.f32 1.0, %v2207_v62  ;;  %v2065_v52 = vadd.f32 %v2064_v15, %v2051_v31  ;;  %v2090_v8 = vpop.f32.mrf.mxu0  ;;  %v2104_v18 = vpop.f32.mrf.mxu1  ;;  %v2303_v15 = vmul.f32 0.87758255, %v5498_v14 }
 0x327   :  { %v2105_v24 = vadd.f32 %v2104_v18, %v2090_v8  ;;  %v3454_v18 = vadd.f32 -0.23971277, %v5498_v14 }
 0x328   :  { %v2219_v19 = vmax.f32 %v2213_v17, 0.0  ;;  %v2079_v20 = vadd.f32 %v2078_v16, %v2065_v52 }
 0x32a   :  { %v2225_v21 = vmin.f32 %v2219_v19, 1.0  ;;  %v5502_v22 = vmul.f32 %v2195_v11, %v2079_v20  ;;  %v2380_v19 = vsub.f32 1.0, %v3460_v1 }
 0x32c   :  { %3734 = vrsqrt.f32 %v2225_v21  ;;  %v2210_v12 = vmul.f32 %v5502_v22, %v5502_v22  ;;  %vm2238_vm8 = vcmp.eq.f32.partialorder %v2225_v21, inf  ;;  %v2241_v5 = vand.u32 2147483648, %v2225_v21 }
 0x32d   :  { %v2118_v26 = vpop.f32.mrf.mxu2  ;;  %v2132_v50 = vpop.f32.mrf.mxu3  ;;  %vm2240_vm9 = vcmp.eq.f32.partialorder %v2225_v21, 0.0  ;;  %vm2324_vm14 = vcmp.gt.f32.partialorder %v5502_v22, -0.87758255 }
 0x32e   :  { %v2119_v43 = vadd.f32 %v2118_v26, %v2105_v24  ;;  %v2216_v53 = vsub.f32 1.0, %v2210_v12  ;;  %v2092_v54 = vpop.f32.mrf.mxu0  ;;  %v2106_v25 = vpop.f32.mrf.mxu1 }
 0x32f   :  { %v2107_v33 = vadd.f32 %v2106_v25, %v2092_v54 }
 0x330   :  { %v2133_v39 = vadd.f32 %v2132_v50, %v2119_v43  ;;  %v2222_v59 = vmax.f32 %v2216_v53, 0.0  ;;  %v5548_v43 = vadd.s32 128, %v5515_v34 }
 0x332   :  { %v3735_v27 = vpop.eup %3734  ;;  %v5509_v32 = vmul.f32 %v2196_v51, %v2133_v39  ;;  %v5511_v55 = vmin.f32 %v2222_v59, 1.0  ;;  %vm2357_vm12 = vcmp.eq.s32.totalorder %v5548_v43, %v5507_v28  ;;  %vm2360_vm1 = vcmp.eq.s32.totalorder %v5548_v43, %v5520_v46 }
 0x333   :  { %v2232_v7 = vmul.f32 %v3735_v27, %v2225_v21 }
 0x334   :  { %v2208_v0 = vmul.f32 %v5509_v32, %v5509_v32  ;;  %3736 = vrsqrt.f32 %v5511_v55  ;;  %vm2274_vm11 = vcmp.eq.f32.partialorder %v5511_v55, inf  ;;  %vm2276_vm13 = vcmp.eq.f32.partialorder %v5511_v55, 0.0 }
 0x335   :  { %v2233_v60 = vmul.f32 %v3735_v27, %v2232_v7  ;;  %v2120_v35 = vpop.f32.mrf.mxu2  ;;  %v2134_v38 = vpop.f32.mrf.mxu3  ;;  %v2304_v4 = vmul.f32 0.87758255, %v5509_v32  ;;  %vm2322_vm2 = vcmp.gt.f32.partialorder %v5509_v32, -0.87758255 }
 0x336   :  { %v2214_v36 = vsub.f32 1.0, %v2208_v0  ;;  %v2121_v37 = vadd.f32 %v2120_v35, %v2107_v33  ;;  %v2277_v33 = vand.u32 2147483648, %v5511_v55 }
 0x337   :  { %v2234_v40 = vmul.f32 0.5, %v2233_v60  ;;  %v2146_v57 = vpop.f32.mrf.mxu0  ;;  %v2160_v58 = vpop.f32.mrf.mxu1 }
 0x338   :  { %v2220_v41 = vmax.f32 %v2214_v36, 0.0  ;;  %v2135_v42 = vadd.f32 %v2134_v38, %v2121_v37  ;;  %v2161_v3 = vadd.f32 %v2160_v58, %v2146_v57  ;;  %v2306_v57 = vmul.f32 0.87758255, %v5502_v22 }
 0x339   :  { %v2235_v44 = vsub.f32 1.5, %v2234_v40 }
 0x33a   :  { %v5522_v48 = vmin.f32 %v2220_v41, 1.0  ;;  %v5524_v56 = vmul.f32 %v2196_v51, %v2135_v42  ;;  %v3737_v47 = vpop.eup %3736 }
 0x33b   :  { %v2236_v61 = vmul.f32 %v3735_v27, %v2235_v44  ;;  %v2268_v49 = vmul.f32 %v3737_v47, %v5511_v55  ;;  %v2386_v27 = vmul.f32 %v2380_v19, %v5498_v14 }
 0x33c   :  { %3738 = vrsqrt.f32 %v5522_v48  ;;  %v2211_v2 = vmul.f32 %v5524_v56, %v5524_v56  ;;  %vm2250_vm15 = vcmp.eq.f32.partialorder %v5522_v48, inf  ;;  %vm2252_vm0 = vcmp.eq.f32.partialorder %v5522_v48, 0.0 }
 0x33d   :  { %v2237_v45 = vmul.f32 %v2236_v61, %v2225_v21  ;;  %v2269_v6 = vmul.f32 %v3737_v47, %v2268_v49  ;;  %vm2325_vm5 = vcmp.gt.f32.partialorder %v5524_v56, -0.87758255 }
 0x33e   :  { %v2174_v9 = vpop.f32.mrf.mxu2  ;;  %v2217_v23 = vsub.f32 1.0, %v2211_v2  ;;  %v2188_v31 = vpop.f32.mrf.mxu3 }
 0x33f   :  { %v2239_v11 = vsel %vm2238_vm8, %v2225_v21, %v2237_v45  ;;  %v2175_v13 = vadd.f32 %v2174_v9, %v2161_v3  ;;  %v2270_v62 = vmul.f32 0.5, %v2269_v6  ;;  %v3463_v21 = vsel %vm2359_vm7, 1.0, %v3747_v63  ;;  %v2148_v53 = vpop.f32.mrf.mxu0  ;;  %v2162_v39 = vpop.f32.mrf.mxu1 }
 0x340   :  { %v2242_v30 = vsel %vm2240_vm9, %v2241_v5, %v2239_v11  ;;  %v2223_v17 = vmax.f32 %v2217_v23, 0.0  ;;  %v2383_v25 = vsub.f32 1.0, %v3463_v21  ;;  %v2163_v36 = vadd.f32 %v2162_v39, %v2148_v53 }
 0x341   :  { %v2309_v16 = vmul.f32 0.47942555, %v2242_v30  ;;  %v2189_v52 = vadd.f32 %v2188_v31, %v2175_v13  ;;  %v2271_v20 = vsub.f32 1.5, %v2270_v62  ;;  %v3457_v3 = vadd.f32 -0.23971277, %v5502_v22 }
 0x342   :  { %v3739_v8 = vpop.eup %3738  ;;  %v5541_v26 = vmin.f32 %v2223_v17, 1.0  ;;  %v2389_v6 = vmul.f32 %v2383_v25, %v5502_v22  ;;  %v2253_v30 = vand.u32 2147483648, %v5522_v48 }
 0x343   :  { %v2315_v24 = vsub.f32 %v2303_v15, %v2309_v16  ;;  %v2244_v12 = vmul.f32 %v3739_v8, %v5522_v48  ;;  %v5545_v50 = vmul.f32 %v2197_v10, %v2189_v52  ;;  %v2272_v51 = vmul.f32 %v3737_v47, %v2271_v20 }
 0x344   :  { %3740 = vrsqrt.f32 %v5541_v26  ;;  %vm2286_vm3 = vcmp.eq.f32.partialorder %v5541_v26, inf  ;;  %v2289_v43 = vand.u32 2147483648, %v5541_v26  ;;  %vm2288_vm4 = vcmp.eq.f32.partialorder %v5541_v26, 0.0 }
 0x345   :  { %v2333_v54 = vsel %vm2321_vm10, %v2315_v24, %v3454_v18  ;;  %v2245_v29 = vmul.f32 %v3739_v8, %v2244_v12  ;;  %v2273_v7 = vmul.f32 %v2272_v51, %v5511_v55  ;;  %v2209_v35 = vmul.f32 %v5545_v50, %v5545_v50 }
 0x346   :  { %v2374_v59 = vmul.f32 %v3460_v1, %v2333_v54  ;;  %v2176_v0 = vpop.f32.mrf.mxu2  ;;  %v2190_v47 = vpop.f32.mrf.mxu3  ;;  %v3461_v1 = vsel %vm2357_vm12, 1.0, %v3747_v63  ;;  %vm2323_vm9 = vcmp.gt.f32.partialorder %v5545_v50, -0.87758255 }
 0x347   :  { %v2246_v60 = vmul.f32 0.5, %v2245_v29  ;;  %v2275_v38 = vsel %vm2274_vm11, %v5511_v55, %v2273_v7  ;;  %v2215_v41 = vsub.f32 1.0, %v2209_v35  ;;  %v2177_v42 = vadd.f32 %v2176_v0, %v2163_v36 }
 0x348   :  { %v2392_v37 = vadd.f32 %v2386_v27, %v2374_v59  ;;  %v2278_v14 = vsel %vm2276_vm13, %v2277_v33, %v2275_v38  ;;  %v3464_v59 = vsel %vm2360_vm1, 1.0, %v3747_v63  ;;  %v2307_v35 = vmul.f32 0.87758255, %v5524_v56 }
 0x349   :  { %v2247_v40 = vsub.f32 1.5, %v2246_v60  ;;  %v2312_v58 = vmul.f32 0.47942555, %v2278_v14  ;;  %v2221_v45 = vmax.f32 %v2215_v41, 0.0  ;;  %v2191_v2 = vadd.f32 %v2190_v47, %v2177_v42 }
 0x34a   :  { %v2398_v44 = vmul.f32 64.0, %v2392_v37  ;;  %v3741_v61 = vpop.eup %3740  ;;  %v2343_v38 = vadd.s32 256, %v5515_v34  ;;  %v2384_v14 = vsub.f32 1.0, %v3464_v59  ;;  %v3458_v41 = vadd.f32 -0.23971277, %v5524_v56 }
 0x34b   :  { %v2248_v49 = vmul.f32 %v3739_v8, %v2247_v40  ;;  %v2318_v55 = vsub.f32 %v2306_v57, %v2312_v58  ;;  %v2280_v5 = vmul.f32 %v3741_v61, %v5541_v26  ;;  %v5572_v11 = vmin.f32 %v2221_v45, 1.0 }
 0x34c   :  { %2404 = vst [vmem:[%s5645_s10] sm:$0xff] %v2398_v44  ;;  %v5576_v23 = vmul.f32 %v2197_v10, %v2191_v2  ;;  %v2381_v8 = vsub.f32 1.0, %v3461_v1  ;;  %vm2358_vm6 = vcmp.eq.s32.totalorder %v2343_v38, %v5507_v28  ;;  %v2390_v47 = vmul.f32 %v2384_v14, %v5524_v56 }
 0x34d   :  { %v2249_v9 = vmul.f32 %v2248_v49, %v5522_v48  ;;  %v2336_v13 = vsel %vm2324_vm14, %v2318_v55, %v3457_v3  ;;  %v2281_v62 = vmul.f32 %v3741_v61, %v2280_v5  ;;  %3742 = vrsqrt.f32 %v5572_v11 }
 0x34e   :  { %v2377_v31 = vmul.f32 %v3463_v21, %v2336_v13  ;;  %v2212_v52 = vmul.f32 %v5576_v23, %v5576_v23  ;;  %v3455_v21 = vadd.f32 -0.23971277, %v5509_v32  ;;  %v2387_v54 = vmul.f32 %v2381_v8, %v5509_v32 }
 0x34f   :  { %v2251_v15 = vsel %vm2250_vm15, %v5522_v48, %v2249_v9  ;;  %v2282_v16 = vmul.f32 0.5, %v2281_v62  ;;  %vm2262_vm7 = vcmp.eq.f32.partialorder %v5572_v11, inf  ;;  %v2265_v49 = vand.u32 2147483648, %v5572_v11 }
 0x350   :  { %v2254_v22 = vsel %vm2252_vm0, %v2253_v30, %v2251_v15  ;;  %v2395_v17 = vadd.f32 %v2389_v6, %v2377_v31  ;;  %v2218_v24 = vsub.f32 1.0, %v2212_v52  ;;  %v3462_v45 = vsel %vm2358_vm6, 1.0, %v3747_v63 }
 0x351   :  { %v2310_v10 = vmul.f32 0.47942555, %v2254_v22  ;;  %v2283_v18 = vsub.f32 1.5, %v2282_v16  ;;  %vm2264_vm8 = vcmp.eq.f32.partialorder %v5572_v11, 0.0  ;;  %v2305_v5 = vmul.f32 0.87758255, %v5545_v50 }
 0x352   :  { %v2401_v19 = vmul.f32 64.0, %v2395_v17  ;;  %v2224_v53 = vmax.f32 %v2218_v24, 0.0  ;;  %v2382_v9 = vsub.f32 1.0, %v3462_v45  ;;  %v3456_v30 = vadd.f32 -0.23971277, %v5545_v50 }
 0x353   :  { %v2316_v20 = vsub.f32 %v2304_v4, %v2310_v10  ;;  %v2284_v48 = vmul.f32 %v3741_v61, %v2283_v18  ;;  %v3743_v12 = vpop.eup %3742  ;;  %vm2361_vm10 = vcmp.eq.s32.totalorder %v2343_v38, %v5520_v46  ;;  %vm2326_vm13 = vcmp.gt.f32.partialorder %v5576_v23, -0.87758255 }
 0x354   :  { %2407 = vst [vmem:[%s5645_s10 + $0x18] sm:$0xff] %v2401_v19  ;;  %v2256_v29 = vmul.f32 %v3743_v12, %v5572_v11  ;;  %v2230_v27 = vmin.f32 %v2224_v53, 1.0  ;;  %v2388_v22 = vmul.f32 %v2382_v9, %v5545_v50  ;;  %v3465_v10 = vsel %vm2361_vm10, 1.0, %v3747_v63 }
 0x355   :  { %v2334_v51 = vsel %vm2322_vm2, %v2316_v20, %v3455_v21  ;;  %v2285_v25 = vmul.f32 %v2284_v48, %v5541_v26  ;;  %v2308_v19 = vmul.f32 0.87758255, %v5576_v23  ;;  %v2385_v21 = vsub.f32 1.0, %v3465_v10 }
 0x356   :  { %v2375_v39 = vmul.f32 %v3461_v1, %v2334_v51  ;;  %v2257_v33 = vmul.f32 %v3743_v12, %v2256_v29  ;;  %3744 = vrsqrt.f32 %v2230_v27  ;;  %vm2298_vm11 = vcmp.eq.f32.partialorder %v2230_v27, inf }
 0x357   :  { %v2287_v0 = vsel %vm2286_vm3, %v5541_v26, %v2285_v25  ;;  %v2301_v4 = vand.u32 2147483648, %v2230_v27  ;;  %vm2300_vm12 = vcmp.eq.f32.partialorder %v2230_v27, 0.0  ;;  %v3459_v50 = vadd.f32 -0.23971277, %v5576_v23 }
 0x358   :  { %v2393_v7 = vadd.f32 %v2387_v54, %v2375_v39  ;;  %v2290_v60 = vsel %vm2288_vm4, %v2289_v43, %v2287_v0  ;;  %v2258_v37 = vmul.f32 0.5, %v2257_v33  ;;  %v2391_v63 = vmul.f32 %v2385_v21, %v5576_v23 }
 0x359   :  { %v2313_v36 = vmul.f32 0.47942555, %v2290_v60 }
 0x35a   :  { %v2399_v32 = vmul.f32 64.0, %v2393_v7  ;;  %v2259_v42 = vsub.f32 1.5, %v2258_v37 }
 0x35b   :  { %v2319_v40 = vsub.f32 %v2307_v35, %v2313_v36 }
 0x35c   :  { %2405 = vst [vmem:[%s5645_s10 + $0x8] sm:$0xff] %v2399_v32  ;;  %v2260_v44 = vmul.f32 %v3743_v12, %v2259_v42  ;;  %v3745_v57 = vpop.eup %3744 }
 0x35d   :  { %v2337_v26 = vsel %vm2325_vm5, %v2319_v40, %v3458_v41  ;;  %v2292_v61 = vmul.f32 %v3745_v57, %v2230_v27 }
 0x35e   :  { %v2378_v58 = vmul.f32 %v3464_v59, %v2337_v26  ;;  %v2261_v34 = vmul.f32 %v2260_v44, %v5572_v11 }
 0x35f   :  { %v2293_v55 = vmul.f32 %v3745_v57, %v2292_v61 }
 0x360   :  { %v2396_v1 = vadd.f32 %v2390_v47, %v2378_v58  ;;  %v2263_v2 = vsel %vm2262_vm7, %v5572_v11, %v2261_v34 }
 0x361   :  { %v2266_v28 = vsel %vm2264_vm8, %v2265_v49, %v2263_v2  ;;  %v2294_v6 = vmul.f32 0.5, %v2293_v55 }
 0x362   :  { %v2402_v3 = vmul.f32 64.0, %v2396_v1  ;;  %v2311_v56 = vmul.f32 0.47942555, %v2266_v28 }
 0x363   :  { %v2295_v62 = vsub.f32 1.5, %v2294_v6 }
 0x364   :  { %2408 = vst [vmem:[%s5645_s10 + $0x20] sm:$0xff] %v2402_v3  ;;  %v2317_v13 = vsub.f32 %v2305_v5, %v2311_v56 }
 0x365   :  { %v2296_v11 = vmul.f32 %v3745_v57, %v2295_v62 }
 0x366   :  { %v2335_v31 = vsel %vm2323_vm9, %v2317_v13, %v3456_v30 }
 0x367   :  { %v2376_v15 = vmul.f32 %v3462_v45, %v2335_v31  ;;  %v2297_v16 = vmul.f32 %v2296_v11, %v2230_v27 }
 0x369   :  { %v2394_v17 = vadd.f32 %v2388_v22, %v2376_v15  ;;  %v2299_v52 = vsel %vm2298_vm11, %v2230_v27, %v2297_v16 }
 0x36a   :  { %v2302_v18 = vsel %vm2300_vm12, %v2301_v4, %v2299_v52 }
 0x36b   :  { %v2400_v8 = vmul.f32 64.0, %v2394_v17  ;;  %v2314_v20 = vmul.f32 0.47942555, %v2302_v18 }
 0x36d   :  { %2406 = vst [vmem:[%s5645_s10 + $0x10] sm:$0xff] %v2400_v8  ;;  %v2320_v46 = vsub.f32 %v2308_v19, %v2314_v20 }
 0x36f   :  { %v2338_v24 = vsel %vm2326_vm13, %v2320_v46, %v3459_v50 }
 0x370   :  { %v2379_v48 = vmul.f32 %v3465_v10, %v2338_v24 }
 0x372   :  { %v2397_v12 = vadd.f32 %v2391_v63, %v2379_v48 }
 0x374   :  { %v2403_v51 = vmul.f32 64.0, %v2397_v12 }
 0x376   :  { %2409 = vst [vmem:[%s5645_s10 + $0x28] sm:$0xff] %v2403_v51 }

</bundles_post_ra>
